<compile_context>
chip_gen: v7x
topology: tpu7x:2x2x1
jax: 0.10.0
libtpu: 0.0.40
codegen_flags: <defaults>
</compile_context>

<pallas_src>
import functools
import numpy as np

import jax
import jax.numpy as jnp
from jax.experimental import pallas as pl
from jax.experimental.pallas import tpu as pltpu

PAD = 0                      # Constants.PAD
MATMUL_DTYPE = jnp.bfloat16  # set to jnp.float32 for a strict-f32 MXU path


# ----------------------------------------------------------------------------
# Host-side helpers (match the PyTorch helper functions)
# ----------------------------------------------------------------------------
def get_sinusoid_encoding_table(n_position, d_hid, padding_idx=None):
    def cal_angle(position, hid_idx):
        return position / np.power(10000, 2 * (hid_idx // 2) / d_hid)

    def get_posi_angle_vec(position):
        return [cal_angle(position, hid_j) for hid_j in range(d_hid)]

    table = np.array([get_posi_angle_vec(p) for p in range(n_position)])
    table[:, 0::2] = np.sin(table[:, 0::2])
    table[:, 1::2] = np.cos(table[:, 1::2])
    if padding_idx is not None:
        table[padding_idx] = 0.0
    return jnp.asarray(table, dtype=jnp.float32)


# ----------------------------------------------------------------------------
# Pallas kernel: whole encoder stack for one batch row per grid step
# ----------------------------------------------------------------------------
def _layer_norm(x, g, b, eps=1e-5):
    mu = jnp.mean(x, axis=-1, keepdims=True)
    var = jnp.mean((x - mu) ** 2, axis=-1, keepdims=True)
    return (x - mu) * jax.lax.rsqrt(var + eps) * g + b


def encoder_stack_kernel(
    x_ref, padk_ref, padq_ref,
    wq_ref, bq_ref, wk_ref, bk_ref, wv_ref, bv_ref,
    fcw_ref, fcb_ref, ln1g_ref, ln1b_ref,
    w1_ref, b1_ref, w2_ref, b2_ref, ln2g_ref, ln2b_ref,
    out_ref, *, n_layers, n_head, d_k, d_v):
    _, L, D = x_ref.shape
    cdt = wq_ref.dtype                                  # matmul compute dtype

    x = x_ref[0]                                        # (L, D) f32
    key_bias = padk_ref[0] * jnp.float32(-1e30)         # (1, L): -1e30 at PAD keys
    npm = 1.0 - padq_ref[0]                             # (L, 1): 0.0 at PAD queries
    inv_temp = jnp.float32(1.0 / np.sqrt(d_k))

    def bmm(a, b):            # (H, M, K) x (H, K, N) -> (H, M, N), f32 acc
        return jax.lax.dot_general(
            a.astype(cdt), b.astype(cdt),
            (((2,), (1,)), ((0,), (0,))),
            preferred_element_type=jnp.float32)

    def bmm_nt(a, b):         # (H, M, K) x (H, N, K) -> (H, M, N), f32 acc
        return jax.lax.dot_general(
            a.astype(cdt), b.astype(cdt),
            (((2,), (2,)), ((0,), (0,))),
            preferred_element_type=jnp.float32)

    def mm(a, b):             # (M, K) x (K, N) -> (M, N), f32 acc
        return jnp.dot(a.astype(cdt), b.astype(cdt),
                       preferred_element_type=jnp.float32)

    for li in range(n_layers):                          # unrolled at trace time
        # ---- Multi-head self attention (head = batch dim of the matmuls) ---
        xh = jnp.broadcast_to(x[None], (n_head, L, D))  # (H, L, D)
        q = (bmm(xh, wq_ref[li]) + bq_ref[li]) * inv_temp   # (H, L, d_k)
        k = bmm(xh, wk_ref[li]) + bk_ref[li]                # (H, L, d_k)
        v = bmm(xh, wv_ref[li]) + bv_ref[li]                # (H, L, d_v)

        s = bmm_nt(q, k) + key_bias[None]               # (H, L, L), masked add
        s = s - jnp.max(s, axis=-1, keepdims=True)
        e = jnp.exp(s)
        attn = e * pl.reciprocal(jnp.sum(e, axis=-1, keepdims=True), approx=True)

        ctx = bmm(attn, v)                              # (H, L, d_v)
        # concat-heads + fc  ==  per-head matmul then sum over heads
        o = jnp.sum(bmm(ctx, fcw_ref[li]), axis=0) + fcb_ref[li]   # (L, D)
        o = _layer_norm(o + x, ln1g_ref[li], ln1b_ref[li])
        o = o * npm                                     # non_pad_mask

        # ---- Position-wise FFN (1x1 convs == matmuls over d_model) ---------
        h1 = jnp.maximum(mm(o, w1_ref[li]) + b1_ref[li], 0.0)
        f = mm(h1, w2_ref[li]) + b2_ref[li]
        f = _layer_norm(f + o, ln2g_ref[li], ln2b_ref[li])
        f = f * npm

        x = f

    out_ref[0] = x


# ----------------------------------------------------------------------------
# Wrapper: parameter packing + pallas_call
# ----------------------------------------------------------------------------
_PARAM_ORDER = ['wq', 'bq', 'wk', 'bk', 'wv', 'bv', 'fcw', 'fcb', 'ln1g',
                'ln1b', 'w1', 'b1', 'w2', 'b2', 'ln2g', 'ln2b']


def pack_layer_params(layer_params, n_head, d_k, d_v):
    """Stack per-layer params along a leading layer axis and pre-split heads."""
    nl = len(layer_params)

    def stack(name):
        return jnp.stack([p[name] for p in layer_params])

    d_model = layer_params[0]['wq'].shape[0]

    def split_w(w, dh):   # (nl, D, H*dh) -> (nl, H, D, dh)
        return w.reshape(nl, d_model, n_head, dh).transpose(0, 2, 1, 3)

    def split_b(b, dh):   # (nl, 1, H*dh) -> (nl, H, 1, dh)
        return b.reshape(nl, n_head, dh)[:, :, None, :]

    mdt = MATMUL_DTYPE
    return dict(
        wq=split_w(stack('wq'), d_k).astype(mdt), bq=split_b(stack('bq'), d_k),
        wk=split_w(stack('wk'), d_k).astype(mdt), bk=split_b(stack('bk'), d_k),
        wv=split_w(stack('wv'), d_v).astype(mdt), bv=split_b(stack('bv'), d_v),
        fcw=stack('fcw').reshape(nl, n_head, d_v, d_model).astype(mdt),
        fcb=stack('fcb'),
        ln1g=stack('ln1g'), ln1b=stack('ln1b'),
        w1=stack('w1').astype(mdt), b1=stack('b1'),
        w2=stack('w2').astype(mdt), b2=stack('b2'),
        ln2g=stack('ln2g'), ln2b=stack('ln2b'),
    )


def encoder_forward(src_seq, src_pos, word_emb, pos_table, packed,
                    *, n_layers, n_head, d_k, d_v):
    B, L = src_seq.shape
    D = word_emb.shape[1]

    # TODO(synk): embedding row gathers (word + positional) are data-dependent
    # gathers with no rectangular Pallas BlockSpec equivalent; done host-side.
    enc_in = (jnp.take(word_emb, src_seq, axis=0)
              + jnp.take(pos_table, src_pos, axis=0)).astype(jnp.float32)

    is_pad = (src_seq == PAD).astype(jnp.float32)       # (B, L)
    pad_k = is_pad[:, None, :]                          # (B, 1, L) key pad
    pad_q = is_pad[:, :, None]                          # (B, L, 1) query pad

    weights = [packed[n] for n in _PARAM_ORDER]

    kernel = functools.partial(encoder_stack_kernel, n_layers=n_layers,
                               n_head=n_head, d_k=d_k, d_v=d_v)

    in_specs = ([pl.BlockSpec((1, L, D), lambda b: (b, 0, 0)),
                 pl.BlockSpec((1, 1, L), lambda b: (b, 0, 0)),
                 pl.BlockSpec((1, L, 1), lambda b: (b, 0, 0))]
                + [pl.BlockSpec(w.shape, lambda b, nd=w.ndim: (0,) * nd)
                   for w in weights])

    out = pl.pallas_call(
        kernel,
        out_shape=jax.ShapeDtypeStruct((B, L, D), jnp.float32),
        grid=(B,),
        in_specs=in_specs,
        out_specs=pl.BlockSpec((1, L, D), lambda b: (b, 0, 0)),
        compiler_params=pltpu.CompilerParams(
            dimension_semantics=("parallel",)),
    )(enc_in, pad_k, pad_q, *weights)
    return (out,)


# ----------------------------------------------------------------------------
# Deterministic parameter init (PyTorch-style shapes, packed afterwards)
# ----------------------------------------------------------------------------
def init_layer_params(key, d_model, d_inner, n_head, d_k, d_v):
    ks = jax.random.split(key, 10)
    s = 0.1
    f32 = jnp.float32
    return dict(
        wq=jax.random.normal(ks[0], (d_model, n_head * d_k), f32) * s,
        bq=jax.random.normal(ks[1], (1, n_head * d_k), f32) * s,
        wk=jax.random.normal(ks[2], (d_model, n_head * d_k), f32) * s,
        bk=jax.random.normal(ks[3], (1, n_head * d_k), f32) * s,
        wv=jax.random.normal(ks[4], (d_model, n_head * d_v), f32) * s,
        bv=jax.random.normal(ks[5], (1, n_head * d_v), f32) * s,
        fcw=jax.random.normal(ks[6], (n_head * d_v, d_model), f32) * s,
        fcb=jnp.zeros((1, d_model), f32),
        ln1g=jnp.ones((1, d_model), f32),
        ln1b=jnp.zeros((1, d_model), f32),
        w1=jax.random.normal(ks[7], (d_model, d_inner), f32) * s,
        b1=jnp.zeros((1, d_inner), f32),
        w2=jax.random.normal(ks[8], (d_inner, d_model), f32) * s,
        b2=jnp.zeros((1, d_model), f32),
        ln2g=jnp.ones((1, d_model), f32),
        ln2b=jnp.zeros((1, d_model), f32),
    )


if __name__ == "__main__":
    # Small shapes consistent with the module
    B, L = 2, 8
    len_max_seq = 8
    n_src_vocab = 16
    d_word_vec = d_model = 32
    n_layers, n_head, d_k, d_v, d_inner = 2, 4, 8, 8, 64

    key = jax.random.PRNGKey(0)
    k_emb, *k_layers = jax.random.split(key, n_layers + 1)

    # Word embedding table with padding_idx=PAD row zeroed.
    word_emb = jax.random.normal(k_emb, (n_src_vocab, d_word_vec),
                                 jnp.float32) * 0.1
    word_emb = word_emb.at[PAD].set(0.0)
    pos_table = get_sinusoid_encoding_table(len_max_seq + 1, d_word_vec,
                                            padding_idx=0)

    # Token ids (PAD=0 at the tail of the second sequence) and positions.
    src_seq = jnp.array([[3, 5, 7, 2, 9, 4, 6, 8],
                         [4, 2, 6, 1, 3, 5, 0, 0]], dtype=jnp.int32)
    src_pos = jnp.array([[1, 2, 3, 4, 5, 6, 7, 8],
                         [1, 2, 3, 4, 5, 6, 0, 0]], dtype=jnp.int32)

    layer_params = [init_layer_params(k, d_model, d_inner, n_head, d_k, d_v)
                    for k in k_layers]
    packed = pack_layer_params(layer_params, n_head, d_k, d_v)

    (out,) = encoder_forward(src_seq, src_pos, word_emb, pos_table, packed,
                             n_layers=n_layers, n_head=n_head,
                             d_k=d_k, d_v=d_v)
    out = jax.block_until_ready(out)

    assert out.shape == (B, L, d_model)
    assert bool(jnp.all(jnp.isfinite(out)))
    # padded positions must be exactly zero (non_pad_mask applied last)
    assert bool(jnp.all(out[1, 6:] == 0.0))
    print("KERNEL_OK")
</pallas_src>

<mosaic_0001>
module attributes {stable_mosaic.version = 11 : i64} {
  func.func @encoder_stack_kernel(%arg0: i32, %arg1: memref<1x8x32xf32, #tpu.memory_space<vmem>>, %arg2: memref<1x1x8xf32, #tpu.memory_space<vmem>>, %arg3: memref<1x8x1xf32, #tpu.memory_space<vmem>>, %arg4: memref<2x4x32x8xbf16, #tpu.memory_space<vmem>>, %arg5: memref<2x4x1x8xf32, #tpu.memory_space<vmem>>, %arg6: memref<2x4x32x8xbf16, #tpu.memory_space<vmem>>, %arg7: memref<2x4x1x8xf32, #tpu.memory_space<vmem>>, %arg8: memref<2x4x32x8xbf16, #tpu.memory_space<vmem>>, %arg9: memref<2x4x1x8xf32, #tpu.memory_space<vmem>>, %arg10: memref<2x4x8x32xbf16, #tpu.memory_space<vmem>>, %arg11: memref<2x1x32xf32, #tpu.memory_space<vmem>>, %arg12: memref<2x1x32xf32, #tpu.memory_space<vmem>>, %arg13: memref<2x1x32xf32, #tpu.memory_space<vmem>>, %arg14: memref<2x32x64xbf16, #tpu.memory_space<vmem>>, %arg15: memref<2x1x64xf32, #tpu.memory_space<vmem>>, %arg16: memref<2x64x32xbf16, #tpu.memory_space<vmem>>, %arg17: memref<2x1x32xf32, #tpu.memory_space<vmem>>, %arg18: memref<2x1x32xf32, #tpu.memory_space<vmem>>, %arg19: memref<2x1x32xf32, #tpu.memory_space<vmem>>, %arg20: memref<1x8x32xf32, #tpu.memory_space<vmem>>) attributes {dimension_semantics = [#tpu.dimension_semantics<parallel>], iteration_bounds = array<i64: 2>, scalar_prefetch = 0 : i64, scratch_operands = 0 : i64, tpu.core_type = #tpu.core_type<tc>, window_params = [{transform_indices = @transform_0, window_bounds = array<i64: 1, 8, 32>}, {transform_indices = @transform_1, window_bounds = array<i64: 1, 1, 8>}, {transform_indices = @transform_2, window_bounds = array<i64: 1, 8, 1>}, {pipeline_mode = #tpu.pipeline_mode<synchronous>, transform_indices = @transform_3, window_bounds = array<i64: 2, 4, 32, 8>}, {pipeline_mode = #tpu.pipeline_mode<synchronous>, transform_indices = @transform_4, window_bounds = array<i64: 2, 4, 1, 8>}, {pipeline_mode = #tpu.pipeline_mode<synchronous>, transform_indices = @transform_5, window_bounds = array<i64: 2, 4, 32, 8>}, {pipeline_mode = #tpu.pipeline_mode<synchronous>, transform_indices = @transform_6, window_bounds = array<i64: 2, 4, 1, 8>}, {pipeline_mode = #tpu.pipeline_mode<synchronous>, transform_indices = @transform_7, window_bounds = array<i64: 2, 4, 32, 8>}, {pipeline_mode = #tpu.pipeline_mode<synchronous>, transform_indices = @transform_8, window_bounds = array<i64: 2, 4, 1, 8>}, {pipeline_mode = #tpu.pipeline_mode<synchronous>, transform_indices = @transform_9, window_bounds = array<i64: 2, 4, 8, 32>}, {pipeline_mode = #tpu.pipeline_mode<synchronous>, transform_indices = @transform_10, window_bounds = array<i64: 2, 1, 32>}, {pipeline_mode = #tpu.pipeline_mode<synchronous>, transform_indices = @transform_11, window_bounds = array<i64: 2, 1, 32>}, {pipeline_mode = #tpu.pipeline_mode<synchronous>, transform_indices = @transform_12, window_bounds = array<i64: 2, 1, 32>}, {pipeline_mode = #tpu.pipeline_mode<synchronous>, transform_indices = @transform_13, window_bounds = array<i64: 2, 32, 64>}, {pipeline_mode = #tpu.pipeline_mode<synchronous>, transform_indices = @transform_14, window_bounds = array<i64: 2, 1, 64>}, {pipeline_mode = #tpu.pipeline_mode<synchronous>, transform_indices = @transform_15, window_bounds = array<i64: 2, 64, 32>}, {pipeline_mode = #tpu.pipeline_mode<synchronous>, transform_indices = @transform_16, window_bounds = array<i64: 2, 1, 32>}, {pipeline_mode = #tpu.pipeline_mode<synchronous>, transform_indices = @transform_17, window_bounds = array<i64: 2, 1, 32>}, {pipeline_mode = #tpu.pipeline_mode<synchronous>, transform_indices = @transform_18, window_bounds = array<i64: 2, 1, 32>}, {transform_indices = @transform_19, window_bounds = array<i64: 1, 8, 32>}]} {
    %c0 = arith.constant 0 : index
    %c0_0 = arith.constant 0 : index
    %c0_1 = arith.constant 0 : index
    %0 = vector.load %arg1[%c0, %c0_0, %c0_1] : memref<1x8x32xf32, #tpu.memory_space<vmem>>, vector<1x8x32xf32>
    %1 = vector.shape_cast %0 : vector<1x8x32xf32> to vector<8x32xf32>
    %c0_2 = arith.constant 0 : index
    %c0_3 = arith.constant 0 : index
    %c0_4 = arith.constant 0 : index
    %2 = vector.load %arg2[%c0_2, %c0_3, %c0_4] : memref<1x1x8xf32, #tpu.memory_space<vmem>>, vector<1x1x8xf32>
    %3 = vector.shape_cast %2 : vector<1x1x8xf32> to vector<1x8xf32>
    %cst = arith.constant -1.000000e+30 : f32
    %4 = vector.broadcast %cst : f32 to vector<1x8xf32>
    %5 = arith.mulf %3, %4 : vector<1x8xf32>
    %c0_5 = arith.constant 0 : index
    %c0_6 = arith.constant 0 : index
    %c0_7 = arith.constant 0 : index
    %6 = vector.load %arg3[%c0_5, %c0_6, %c0_7] : memref<1x8x1xf32, #tpu.memory_space<vmem>>, vector<1x8x1xf32>
    %7 = vector.shape_cast %6 : vector<1x8x1xf32> to vector<8x1xf32>
    %cst_8 = arith.constant 1.000000e+00 : f32
    %8 = vector.broadcast %cst_8 : f32 to vector<8x1xf32>
    %9 = arith.subf %8, %7 : vector<8x1xf32>
    %10 = vector.shape_cast %1 : vector<8x32xf32> to vector<1x8x32xf32>
    %11 = vector.shape_cast %10 : vector<1x8x32xf32> to vector<1x8x32xf32>
    %12 = vector.broadcast %11 : vector<1x8x32xf32> to vector<4x8x32xf32>
    %c0_9 = arith.constant 0 : index
    %c0_10 = arith.constant 0 : index
    %c0_11 = arith.constant 0 : index
    %c0_12 = arith.constant 0 : index
    %13 = vector.load %arg4[%c0_9, %c0_10, %c0_11, %c0_12] : memref<2x4x32x8xbf16, #tpu.memory_space<vmem>>, vector<1x4x32x8xbf16>
    %14 = vector.shape_cast %13 : vector<1x4x32x8xbf16> to vector<4x32x8xbf16>
    %15 = arith.truncf %12 : vector<4x8x32xf32> to vector<4x8x32xbf16>
    %cst_13 = arith.constant dense<0.000000e+00> : vector<4x8x8xf32>
    %16 = tpu.matmul %15, %14, %cst_13 {dimension_numbers = #tpu.dot_dimension_numbers<[2], [1], [1], [2], [0, 0, 0, 1, 1, 2], [0], [0]>} : vector<4x8x32xbf16>, vector<4x32x8xbf16>, vector<4x8x8xf32> -> vector<4x8x8xf32>
    %c0_14 = arith.constant 0 : index
    %c0_15 = arith.constant 0 : index
    %c0_16 = arith.constant 0 : index
    %c0_17 = arith.constant 0 : index
    %17 = vector.load %arg5[%c0_14, %c0_15, %c0_16, %c0_17] : memref<2x4x1x8xf32, #tpu.memory_space<vmem>>, vector<1x4x1x8xf32>
    %18 = vector.shape_cast %17 : vector<1x4x1x8xf32> to vector<4x1x8xf32>
    %19 = vector.broadcast %18 : vector<4x1x8xf32> to vector<4x8x8xf32>
    %20 = arith.addf %16, %19 : vector<4x8x8xf32>
    %cst_18 = arith.constant 0.353553385 : f32
    %21 = vector.broadcast %cst_18 : f32 to vector<4x8x8xf32>
    %22 = arith.mulf %20, %21 : vector<4x8x8xf32>
    %c0_19 = arith.constant 0 : index
    %c0_20 = arith.constant 0 : index
    %c0_21 = arith.constant 0 : index
    %c0_22 = arith.constant 0 : index
    %23 = vector.load %arg6[%c0_19, %c0_20, %c0_21, %c0_22] : memref<2x4x32x8xbf16, #tpu.memory_space<vmem>>, vector<1x4x32x8xbf16>
    %24 = vector.shape_cast %23 : vector<1x4x32x8xbf16> to vector<4x32x8xbf16>
    %25 = arith.truncf %12 : vector<4x8x32xf32> to vector<4x8x32xbf16>
    %cst_23 = arith.constant dense<0.000000e+00> : vector<4x8x8xf32>
    %26 = tpu.matmul %25, %24, %cst_23 {dimension_numbers = #tpu.dot_dimension_numbers<[2], [1], [1], [2], [0, 0, 0, 1, 1, 2], [0], [0]>} : vector<4x8x32xbf16>, vector<4x32x8xbf16>, vector<4x8x8xf32> -> vector<4x8x8xf32>
    %c0_24 = arith.constant 0 : index
    %c0_25 = arith.constant 0 : index
    %c0_26 = arith.constant 0 : index
    %c0_27 = arith.constant 0 : index
    %27 = vector.load %arg7[%c0_24, %c0_25, %c0_26, %c0_27] : memref<2x4x1x8xf32, #tpu.memory_space<vmem>>, vector<1x4x1x8xf32>
    %28 = vector.shape_cast %27 : vector<1x4x1x8xf32> to vector<4x1x8xf32>
    %29 = vector.broadcast %28 : vector<4x1x8xf32> to vector<4x8x8xf32>
    %30 = arith.addf %26, %29 : vector<4x8x8xf32>
    %c0_28 = arith.constant 0 : index
    %c0_29 = arith.constant 0 : index
    %c0_30 = arith.constant 0 : index
    %c0_31 = arith.constant 0 : index
    %31 = vector.load %arg8[%c0_28, %c0_29, %c0_30, %c0_31] : memref<2x4x32x8xbf16, #tpu.memory_space<vmem>>, vector<1x4x32x8xbf16>
    %32 = vector.shape_cast %31 : vector<1x4x32x8xbf16> to vector<4x32x8xbf16>
    %33 = arith.truncf %12 : vector<4x8x32xf32> to vector<4x8x32xbf16>
    %cst_32 = arith.constant dense<0.000000e+00> : vector<4x8x8xf32>
    %34 = tpu.matmul %33, %32, %cst_32 {dimension_numbers = #tpu.dot_dimension_numbers<[2], [1], [1], [2], [0, 0, 0, 1, 1, 2], [0], [0]>} : vector<4x8x32xbf16>, vector<4x32x8xbf16>, vector<4x8x8xf32> -> vector<4x8x8xf32>
    %c0_33 = arith.constant 0 : index
    %c0_34 = arith.constant 0 : index
    %c0_35 = arith.constant 0 : index
    %c0_36 = arith.constant 0 : index
    %35 = vector.load %arg9[%c0_33, %c0_34, %c0_35, %c0_36] : memref<2x4x1x8xf32, #tpu.memory_space<vmem>>, vector<1x4x1x8xf32>
    %36 = vector.shape_cast %35 : vector<1x4x1x8xf32> to vector<4x1x8xf32>
    %37 = vector.broadcast %36 : vector<4x1x8xf32> to vector<4x8x8xf32>
    %38 = arith.addf %34, %37 : vector<4x8x8xf32>
    %39 = arith.truncf %22 : vector<4x8x8xf32> to vector<4x8x8xbf16>
    %40 = arith.truncf %30 : vector<4x8x8xf32> to vector<4x8x8xbf16>
    %cst_37 = arith.constant dense<0.000000e+00> : vector<4x8x8xf32>
    %41 = tpu.matmul %39, %40, %cst_37 {dimension_numbers = #tpu.dot_dimension_numbers<[2], [2], [1], [1], [0, 0, 0, 1, 1, 1], [0], [0]>} : vector<4x8x8xbf16>, vector<4x8x8xbf16>, vector<4x8x8xf32> -> vector<4x8x8xf32>
    %42 = vector.shape_cast %5 : vector<1x8xf32> to vector<1x1x8xf32>
    %43 = vector.broadcast %42 : vector<1x1x8xf32> to vector<4x8x8xf32>
    %44 = arith.addf %41, %43 : vector<4x8x8xf32>
    %cst_38 = arith.constant dense<0xFF800000> : vector<4x8xf32>
    %45 = vector.multi_reduction <maximumf>, %44, %cst_38 [2] : vector<4x8x8xf32> to vector<4x8xf32>
    %46 = vector.shape_cast %45 : vector<4x8xf32> to vector<4x8x1xf32>
    %47 = vector.broadcast %46 : vector<4x8x1xf32> to vector<4x8x8xf32>
    %48 = arith.subf %44, %47 : vector<4x8x8xf32>
    %49 = math.exp %48 : vector<4x8x8xf32>
    %cst_39 = arith.constant dense<0.000000e+00> : vector<4x8xf32>
    %50 = vector.multi_reduction <add>, %49, %cst_39 [2] : vector<4x8x8xf32> to vector<4x8xf32>
    %51 = vector.shape_cast %50 : vector<4x8xf32> to vector<4x8x1xf32>
    %52 = tpu.reciprocal %51 {approx = true} : vector<4x8x1xf32> -> vector<4x8x1xf32>
    %53 = vector.broadcast %52 : vector<4x8x1xf32> to vector<4x8x8xf32>
    %54 = arith.mulf %49, %53 : vector<4x8x8xf32>
    %55 = arith.truncf %54 : vector<4x8x8xf32> to vector<4x8x8xbf16>
    %56 = arith.truncf %38 : vector<4x8x8xf32> to vector<4x8x8xbf16>
    %cst_40 = arith.constant dense<0.000000e+00> : vector<4x8x8xf32>
    %57 = tpu.matmul %55, %56, %cst_40 {dimension_numbers = #tpu.dot_dimension_numbers<[2], [1], [1], [2], [0, 0, 0, 1, 1, 2], [0], [0]>} : vector<4x8x8xbf16>, vector<4x8x8xbf16>, vector<4x8x8xf32> -> vector<4x8x8xf32>
    %c0_41 = arith.constant 0 : index
    %c0_42 = arith.constant 0 : index
    %c0_43 = arith.constant 0 : index
    %c0_44 = arith.constant 0 : index
    %58 = vector.load %arg10[%c0_41, %c0_42, %c0_43, %c0_44] : memref<2x4x8x32xbf16, #tpu.memory_space<vmem>>, vector<1x4x8x32xbf16>
    %59 = vector.shape_cast %58 : vector<1x4x8x32xbf16> to vector<4x8x32xbf16>
    %60 = arith.truncf %57 : vector<4x8x8xf32> to vector<4x8x8xbf16>
    %cst_45 = arith.constant dense<0.000000e+00> : vector<4x8x32xf32>
    %61 = tpu.matmul %60, %59, %cst_45 {dimension_numbers = #tpu.dot_dimension_numbers<[2], [1], [1], [2], [0, 0, 0, 1, 1, 2], [0], [0]>} : vector<4x8x8xbf16>, vector<4x8x32xbf16>, vector<4x8x32xf32> -> vector<4x8x32xf32>
    %cst_46 = arith.constant dense<0.000000e+00> : vector<8x32xf32>
    %62 = vector.multi_reduction <add>, %61, %cst_46 [0] : vector<4x8x32xf32> to vector<8x32xf32>
    %c0_47 = arith.constant 0 : index
    %c0_48 = arith.constant 0 : index
    %c0_49 = arith.constant 0 : index
    %63 = vector.load %arg11[%c0_47, %c0_48, %c0_49] : memref<2x1x32xf32, #tpu.memory_space<vmem>>, vector<1x1x32xf32>
    %64 = vector.shape_cast %63 : vector<1x1x32xf32> to vector<1x32xf32>
    %65 = vector.broadcast %64 : vector<1x32xf32> to vector<8x32xf32>
    %66 = arith.addf %62, %65 : vector<8x32xf32>
    %67 = arith.addf %66, %1 : vector<8x32xf32>
    %c0_50 = arith.constant 0 : index
    %c0_51 = arith.constant 0 : index
    %c0_52 = arith.constant 0 : index
    %68 = vector.load %arg12[%c0_50, %c0_51, %c0_52] : memref<2x1x32xf32, #tpu.memory_space<vmem>>, vector<1x1x32xf32>
    %69 = vector.shape_cast %68 : vector<1x1x32xf32> to vector<1x32xf32>
    %c0_53 = arith.constant 0 : index
    %c0_54 = arith.constant 0 : index
    %c0_55 = arith.constant 0 : index
    %70 = vector.load %arg13[%c0_53, %c0_54, %c0_55] : memref<2x1x32xf32, #tpu.memory_space<vmem>>, vector<1x1x32xf32>
    %71 = vector.shape_cast %70 : vector<1x1x32xf32> to vector<1x32xf32>
    %cst_56 = arith.constant dense<0.000000e+00> : vector<8xf32>
    %72 = vector.multi_reduction <add>, %67, %cst_56 [1] : vector<8x32xf32> to vector<8xf32>
    %73 = vector.shape_cast %72 : vector<8xf32> to vector<8x1xf32>
    %cst_57 = arith.constant 3.200000e+01 : f32
    %74 = vector.broadcast %cst_57 : f32 to vector<8x1xf32>
    %75 = arith.divf %73, %74 : vector<8x1xf32>
    %76 = vector.broadcast %75 : vector<8x1xf32> to vector<8x32xf32>
    %77 = arith.subf %67, %76 : vector<8x32xf32>
    %78 = arith.mulf %77, %77 : vector<8x32xf32>
    %cst_58 = arith.constant dense<0.000000e+00> : vector<8xf32>
    %79 = vector.multi_reduction <add>, %78, %cst_58 [1] : vector<8x32xf32> to vector<8xf32>
    %80 = vector.shape_cast %79 : vector<8xf32> to vector<8x1xf32>
    %cst_59 = arith.constant 3.200000e+01 : f32
    %81 = vector.broadcast %cst_59 : f32 to vector<8x1xf32>
    %82 = arith.divf %80, %81 : vector<8x1xf32>
    %83 = vector.broadcast %75 : vector<8x1xf32> to vector<8x32xf32>
    %84 = arith.subf %67, %83 : vector<8x32xf32>
    %cst_60 = arith.constant 9.99999974E-6 : f32
    %85 = vector.broadcast %cst_60 : f32 to vector<8x1xf32>
    %86 = arith.addf %82, %85 : vector<8x1xf32>
    %87 = math.rsqrt %86 : vector<8x1xf32>
    %88 = vector.broadcast %87 : vector<8x1xf32> to vector<8x32xf32>
    %89 = arith.mulf %84, %88 : vector<8x32xf32>
    %90 = vector.broadcast %69 : vector<1x32xf32> to vector<8x32xf32>
    %91 = arith.mulf %89, %90 : vector<8x32xf32>
    %92 = vector.broadcast %71 : vector<1x32xf32> to vector<8x32xf32>
    %93 = arith.addf %91, %92 : vector<8x32xf32>
    %94 = vector.broadcast %9 : vector<8x1xf32> to vector<8x32xf32>
    %95 = arith.mulf %93, %94 : vector<8x32xf32>
    %c0_61 = arith.constant 0 : index
    %c0_62 = arith.constant 0 : index
    %c0_63 = arith.constant 0 : index
    %96 = vector.load %arg14[%c0_61, %c0_62, %c0_63] : memref<2x32x64xbf16, #tpu.memory_space<vmem>>, vector<1x32x64xbf16>
    %97 = vector.shape_cast %96 : vector<1x32x64xbf16> to vector<32x64xbf16>
    %98 = arith.truncf %95 : vector<8x32xf32> to vector<8x32xbf16>
    %cst_64 = arith.constant dense<0.000000e+00> : vector<8x64xf32>
    %99 = tpu.matmul %98, %97, %cst_64 {dimension_numbers = #tpu.dot_dimension_numbers<[1], [0], [0], [1], [0, 0, 1, 1], [], []>} : vector<8x32xbf16>, vector<32x64xbf16>, vector<8x64xf32> -> vector<8x64xf32>
    %c0_65 = arith.constant 0 : index
    %c0_66 = arith.constant 0 : index
    %c0_67 = arith.constant 0 : index
    %100 = vector.load %arg15[%c0_65, %c0_66, %c0_67] : memref<2x1x64xf32, #tpu.memory_space<vmem>>, vector<1x1x64xf32>
    %101 = vector.shape_cast %100 : vector<1x1x64xf32> to vector<1x64xf32>
    %102 = vector.broadcast %101 : vector<1x64xf32> to vector<8x64xf32>
    %103 = arith.addf %99, %102 : vector<8x64xf32>
    %cst_68 = arith.constant 0.000000e+00 : f32
    %104 = vector.broadcast %cst_68 : f32 to vector<8x64xf32>
    %105 = arith.maximumf %103, %104 : vector<8x64xf32>
    %c0_69 = arith.constant 0 : index
    %c0_70 = arith.constant 0 : index
    %c0_71 = arith.constant 0 : index
    %106 = vector.load %arg16[%c0_69, %c0_70, %c0_71] : memref<2x64x32xbf16, #tpu.memory_space<vmem>>, vector<1x64x32xbf16>
    %107 = vector.shape_cast %106 : vector<1x64x32xbf16> to vector<64x32xbf16>
    %108 = arith.truncf %105 : vector<8x64xf32> to vector<8x64xbf16>
    %cst_72 = arith.constant dense<0.000000e+00> : vector<8x32xf32>
    %109 = tpu.matmul %108, %107, %cst_72 {dimension_numbers = #tpu.dot_dimension_numbers<[1], [0], [0], [1], [0, 0, 1, 1], [], []>} : vector<8x64xbf16>, vector<64x32xbf16>, vector<8x32xf32> -> vector<8x32xf32>
    %c0_73 = arith.constant 0 : index
    %c0_74 = arith.constant 0 : index
    %c0_75 = arith.constant 0 : index
    %110 = vector.load %arg17[%c0_73, %c0_74, %c0_75] : memref<2x1x32xf32, #tpu.memory_space<vmem>>, vector<1x1x32xf32>
    %111 = vector.shape_cast %110 : vector<1x1x32xf32> to vector<1x32xf32>
    %112 = vector.broadcast %111 : vector<1x32xf32> to vector<8x32xf32>
    %113 = arith.addf %109, %112 : vector<8x32xf32>
    %114 = arith.addf %113, %95 : vector<8x32xf32>
    %c0_76 = arith.constant 0 : index
    %c0_77 = arith.constant 0 : index
    %c0_78 = arith.constant 0 : index
    %115 = vector.load %arg18[%c0_76, %c0_77, %c0_78] : memref<2x1x32xf32, #tpu.memory_space<vmem>>, vector<1x1x32xf32>
    %116 = vector.shape_cast %115 : vector<1x1x32xf32> to vector<1x32xf32>
    %c0_79 = arith.constant 0 : index
    %c0_80 = arith.constant 0 : index
    %c0_81 = arith.constant 0 : index
    %117 = vector.load %arg19[%c0_79, %c0_80, %c0_81] : memref<2x1x32xf32, #tpu.memory_space<vmem>>, vector<1x1x32xf32>
    %118 = vector.shape_cast %117 : vector<1x1x32xf32> to vector<1x32xf32>
    %cst_82 = arith.constant dense<0.000000e+00> : vector<8xf32>
    %119 = vector.multi_reduction <add>, %114, %cst_82 [1] : vector<8x32xf32> to vector<8xf32>
    %120 = vector.shape_cast %119 : vector<8xf32> to vector<8x1xf32>
    %cst_83 = arith.constant 3.200000e+01 : f32
    %121 = vector.broadcast %cst_83 : f32 to vector<8x1xf32>
    %122 = arith.divf %120, %121 : vector<8x1xf32>
    %123 = vector.broadcast %122 : vector<8x1xf32> to vector<8x32xf32>
    %124 = arith.subf %114, %123 : vector<8x32xf32>
    %125 = arith.mulf %124, %124 : vector<8x32xf32>
    %cst_84 = arith.constant dense<0.000000e+00> : vector<8xf32>
    %126 = vector.multi_reduction <add>, %125, %cst_84 [1] : vector<8x32xf32> to vector<8xf32>
    %127 = vector.shape_cast %126 : vector<8xf32> to vector<8x1xf32>
    %cst_85 = arith.constant 3.200000e+01 : f32
    %128 = vector.broadcast %cst_85 : f32 to vector<8x1xf32>
    %129 = arith.divf %127, %128 : vector<8x1xf32>
    %130 = vector.broadcast %122 : vector<8x1xf32> to vector<8x32xf32>
    %131 = arith.subf %114, %130 : vector<8x32xf32>
    %cst_86 = arith.constant 9.99999974E-6 : f32
    %132 = vector.broadcast %cst_86 : f32 to vector<8x1xf32>
    %133 = arith.addf %129, %132 : vector<8x1xf32>
    %134 = math.rsqrt %133 : vector<8x1xf32>
    %135 = vector.broadcast %134 : vector<8x1xf32> to vector<8x32xf32>
    %136 = arith.mulf %131, %135 : vector<8x32xf32>
    %137 = vector.broadcast %116 : vector<1x32xf32> to vector<8x32xf32>
    %138 = arith.mulf %136, %137 : vector<8x32xf32>
    %139 = vector.broadcast %118 : vector<1x32xf32> to vector<8x32xf32>
    %140 = arith.addf %138, %139 : vector<8x32xf32>
    %141 = vector.broadcast %9 : vector<8x1xf32> to vector<8x32xf32>
    %142 = arith.mulf %140, %141 : vector<8x32xf32>
    %143 = vector.shape_cast %142 : vector<8x32xf32> to vector<1x8x32xf32>
    %144 = vector.shape_cast %143 : vector<1x8x32xf32> to vector<1x8x32xf32>
    %145 = vector.broadcast %144 : vector<1x8x32xf32> to vector<4x8x32xf32>
    %c1 = arith.constant 1 : index
    %c0_87 = arith.constant 0 : index
    %c0_88 = arith.constant 0 : index
    %c0_89 = arith.constant 0 : index
    %146 = vector.load %arg4[%c1, %c0_87, %c0_88, %c0_89] : memref<2x4x32x8xbf16, #tpu.memory_space<vmem>>, vector<1x4x32x8xbf16>
    %147 = vector.shape_cast %146 : vector<1x4x32x8xbf16> to vector<4x32x8xbf16>
    %148 = arith.truncf %145 : vector<4x8x32xf32> to vector<4x8x32xbf16>
    %cst_90 = arith.constant dense<0.000000e+00> : vector<4x8x8xf32>
    %149 = tpu.matmul %148, %147, %cst_90 {dimension_numbers = #tpu.dot_dimension_numbers<[2], [1], [1], [2], [0, 0, 0, 1, 1, 2], [0], [0]>} : vector<4x8x32xbf16>, vector<4x32x8xbf16>, vector<4x8x8xf32> -> vector<4x8x8xf32>
    %c1_91 = arith.constant 1 : index
    %c0_92 = arith.constant 0 : index
    %c0_93 = arith.constant 0 : index
    %c0_94 = arith.constant 0 : index
    %150 = vector.load %arg5[%c1_91, %c0_92, %c0_93, %c0_94] : memref<2x4x1x8xf32, #tpu.memory_space<vmem>>, vector<1x4x1x8xf32>
    %151 = vector.shape_cast %150 : vector<1x4x1x8xf32> to vector<4x1x8xf32>
    %152 = vector.broadcast %151 : vector<4x1x8xf32> to vector<4x8x8xf32>
    %153 = arith.addf %149, %152 : vector<4x8x8xf32>
    %cst_95 = arith.constant 0.353553385 : f32
    %154 = vector.broadcast %cst_95 : f32 to vector<4x8x8xf32>
    %155 = arith.mulf %153, %154 : vector<4x8x8xf32>
    %c1_96 = arith.constant 1 : index
    %c0_97 = arith.constant 0 : index
    %c0_98 = arith.constant 0 : index
    %c0_99 = arith.constant 0 : index
    %156 = vector.load %arg6[%c1_96, %c0_97, %c0_98, %c0_99] : memref<2x4x32x8xbf16, #tpu.memory_space<vmem>>, vector<1x4x32x8xbf16>
    %157 = vector.shape_cast %156 : vector<1x4x32x8xbf16> to vector<4x32x8xbf16>
    %158 = arith.truncf %145 : vector<4x8x32xf32> to vector<4x8x32xbf16>
    %cst_100 = arith.constant dense<0.000000e+00> : vector<4x8x8xf32>
    %159 = tpu.matmul %158, %157, %cst_100 {dimension_numbers = #tpu.dot_dimension_numbers<[2], [1], [1], [2], [0, 0, 0, 1, 1, 2], [0], [0]>} : vector<4x8x32xbf16>, vector<4x32x8xbf16>, vector<4x8x8xf32> -> vector<4x8x8xf32>
    %c1_101 = arith.constant 1 : index
    %c0_102 = arith.constant 0 : index
    %c0_103 = arith.constant 0 : index
    %c0_104 = arith.constant 0 : index
    %160 = vector.load %arg7[%c1_101, %c0_102, %c0_103, %c0_104] : memref<2x4x1x8xf32, #tpu.memory_space<vmem>>, vector<1x4x1x8xf32>
    %161 = vector.shape_cast %160 : vector<1x4x1x8xf32> to vector<4x1x8xf32>
    %162 = vector.broadcast %161 : vector<4x1x8xf32> to vector<4x8x8xf32>
    %163 = arith.addf %159, %162 : vector<4x8x8xf32>
    %c1_105 = arith.constant 1 : index
    %c0_106 = arith.constant 0 : index
    %c0_107 = arith.constant 0 : index
    %c0_108 = arith.constant 0 : index
    %164 = vector.load %arg8[%c1_105, %c0_106, %c0_107, %c0_108] : memref<2x4x32x8xbf16, #tpu.memory_space<vmem>>, vector<1x4x32x8xbf16>
    %165 = vector.shape_cast %164 : vector<1x4x32x8xbf16> to vector<4x32x8xbf16>
    %166 = arith.truncf %145 : vector<4x8x32xf32> to vector<4x8x32xbf16>
    %cst_109 = arith.constant dense<0.000000e+00> : vector<4x8x8xf32>
    %167 = tpu.matmul %166, %165, %cst_109 {dimension_numbers = #tpu.dot_dimension_numbers<[2], [1], [1], [2], [0, 0, 0, 1, 1, 2], [0], [0]>} : vector<4x8x32xbf16>, vector<4x32x8xbf16>, vector<4x8x8xf32> -> vector<4x8x8xf32>
    %c1_110 = arith.constant 1 : index
    %c0_111 = arith.constant 0 : index
    %c0_112 = arith.constant 0 : index
    %c0_113 = arith.constant 0 : index
    %168 = vector.load %arg9[%c1_110, %c0_111, %c0_112, %c0_113] : memref<2x4x1x8xf32, #tpu.memory_space<vmem>>, vector<1x4x1x8xf32>
    %169 = vector.shape_cast %168 : vector<1x4x1x8xf32> to vector<4x1x8xf32>
    %170 = vector.broadcast %169 : vector<4x1x8xf32> to vector<4x8x8xf32>
    %171 = arith.addf %167, %170 : vector<4x8x8xf32>
    %172 = arith.truncf %155 : vector<4x8x8xf32> to vector<4x8x8xbf16>
    %173 = arith.truncf %163 : vector<4x8x8xf32> to vector<4x8x8xbf16>
    %cst_114 = arith.constant dense<0.000000e+00> : vector<4x8x8xf32>
    %174 = tpu.matmul %172, %173, %cst_114 {dimension_numbers = #tpu.dot_dimension_numbers<[2], [2], [1], [1], [0, 0, 0, 1, 1, 1], [0], [0]>} : vector<4x8x8xbf16>, vector<4x8x8xbf16>, vector<4x8x8xf32> -> vector<4x8x8xf32>
    %175 = vector.shape_cast %5 : vector<1x8xf32> to vector<1x1x8xf32>
    %176 = vector.broadcast %175 : vector<1x1x8xf32> to vector<4x8x8xf32>
    %177 = arith.addf %174, %176 : vector<4x8x8xf32>
    %cst_115 = arith.constant dense<0xFF800000> : vector<4x8xf32>
    %178 = vector.multi_reduction <maximumf>, %177, %cst_115 [2] : vector<4x8x8xf32> to vector<4x8xf32>
    %179 = vector.shape_cast %178 : vector<4x8xf32> to vector<4x8x1xf32>
    %180 = vector.broadcast %179 : vector<4x8x1xf32> to vector<4x8x8xf32>
    %181 = arith.subf %177, %180 : vector<4x8x8xf32>
    %182 = math.exp %181 : vector<4x8x8xf32>
    %cst_116 = arith.constant dense<0.000000e+00> : vector<4x8xf32>
    %183 = vector.multi_reduction <add>, %182, %cst_116 [2] : vector<4x8x8xf32> to vector<4x8xf32>
    %184 = vector.shape_cast %183 : vector<4x8xf32> to vector<4x8x1xf32>
    %185 = tpu.reciprocal %184 {approx = true} : vector<4x8x1xf32> -> vector<4x8x1xf32>
    %186 = vector.broadcast %185 : vector<4x8x1xf32> to vector<4x8x8xf32>
    %187 = arith.mulf %182, %186 : vector<4x8x8xf32>
    %188 = arith.truncf %187 : vector<4x8x8xf32> to vector<4x8x8xbf16>
    %189 = arith.truncf %171 : vector<4x8x8xf32> to vector<4x8x8xbf16>
    %cst_117 = arith.constant dense<0.000000e+00> : vector<4x8x8xf32>
    %190 = tpu.matmul %188, %189, %cst_117 {dimension_numbers = #tpu.dot_dimension_numbers<[2], [1], [1], [2], [0, 0, 0, 1, 1, 2], [0], [0]>} : vector<4x8x8xbf16>, vector<4x8x8xbf16>, vector<4x8x8xf32> -> vector<4x8x8xf32>
    %c1_118 = arith.constant 1 : index
    %c0_119 = arith.constant 0 : index
    %c0_120 = arith.constant 0 : index
    %c0_121 = arith.constant 0 : index
    %191 = vector.load %arg10[%c1_118, %c0_119, %c0_120, %c0_121] : memref<2x4x8x32xbf16, #tpu.memory_space<vmem>>, vector<1x4x8x32xbf16>
    %192 = vector.shape_cast %191 : vector<1x4x8x32xbf16> to vector<4x8x32xbf16>
    %193 = arith.truncf %190 : vector<4x8x8xf32> to vector<4x8x8xbf16>
    %cst_122 = arith.constant dense<0.000000e+00> : vector<4x8x32xf32>
    %194 = tpu.matmul %193, %192, %cst_122 {dimension_numbers = #tpu.dot_dimension_numbers<[2], [1], [1], [2], [0, 0, 0, 1, 1, 2], [0], [0]>} : vector<4x8x8xbf16>, vector<4x8x32xbf16>, vector<4x8x32xf32> -> vector<4x8x32xf32>
    %cst_123 = arith.constant dense<0.000000e+00> : vector<8x32xf32>
    %195 = vector.multi_reduction <add>, %194, %cst_123 [0] : vector<4x8x32xf32> to vector<8x32xf32>
    %c1_124 = arith.constant 1 : index
    %c0_125 = arith.constant 0 : index
    %c0_126 = arith.constant 0 : index
    %196 = vector.load %arg11[%c1_124, %c0_125, %c0_126] : memref<2x1x32xf32, #tpu.memory_space<vmem>>, vector<1x1x32xf32>
    %197 = vector.shape_cast %196 : vector<1x1x32xf32> to vector<1x32xf32>
    %198 = vector.broadcast %197 : vector<1x32xf32> to vector<8x32xf32>
    %199 = arith.addf %195, %198 : vector<8x32xf32>
    %200 = arith.addf %199, %142 : vector<8x32xf32>
    %c1_127 = arith.constant 1 : index
    %c0_128 = arith.constant 0 : index
    %c0_129 = arith.constant 0 : index
    %201 = vector.load %arg12[%c1_127, %c0_128, %c0_129] : memref<2x1x32xf32, #tpu.memory_space<vmem>>, vector<1x1x32xf32>
    %202 = vector.shape_cast %201 : vector<1x1x32xf32> to vector<1x32xf32>
    %c1_130 = arith.constant 1 : index
    %c0_131 = arith.constant 0 : index
    %c0_132 = arith.constant 0 : index
    %203 = vector.load %arg13[%c1_130, %c0_131, %c0_132] : memref<2x1x32xf32, #tpu.memory_space<vmem>>, vector<1x1x32xf32>
    %204 = vector.shape_cast %203 : vector<1x1x32xf32> to vector<1x32xf32>
    %cst_133 = arith.constant dense<0.000000e+00> : vector<8xf32>
    %205 = vector.multi_reduction <add>, %200, %cst_133 [1] : vector<8x32xf32> to vector<8xf32>
    %206 = vector.shape_cast %205 : vector<8xf32> to vector<8x1xf32>
    %cst_134 = arith.constant 3.200000e+01 : f32
    %207 = vector.broadcast %cst_134 : f32 to vector<8x1xf32>
    %208 = arith.divf %206, %207 : vector<8x1xf32>
    %209 = vector.broadcast %208 : vector<8x1xf32> to vector<8x32xf32>
    %210 = arith.subf %200, %209 : vector<8x32xf32>
    %211 = arith.mulf %210, %210 : vector<8x32xf32>
    %cst_135 = arith.constant dense<0.000000e+00> : vector<8xf32>
    %212 = vector.multi_reduction <add>, %211, %cst_135 [1] : vector<8x32xf32> to vector<8xf32>
    %213 = vector.shape_cast %212 : vector<8xf32> to vector<8x1xf32>
    %cst_136 = arith.constant 3.200000e+01 : f32
    %214 = vector.broadcast %cst_136 : f32 to vector<8x1xf32>
    %215 = arith.divf %213, %214 : vector<8x1xf32>
    %216 = vector.broadcast %208 : vector<8x1xf32> to vector<8x32xf32>
    %217 = arith.subf %200, %216 : vector<8x32xf32>
    %cst_137 = arith.constant 9.99999974E-6 : f32
    %218 = vector.broadcast %cst_137 : f32 to vector<8x1xf32>
    %219 = arith.addf %215, %218 : vector<8x1xf32>
    %220 = math.rsqrt %219 : vector<8x1xf32>
    %221 = vector.broadcast %220 : vector<8x1xf32> to vector<8x32xf32>
    %222 = arith.mulf %217, %221 : vector<8x32xf32>
    %223 = vector.broadcast %202 : vector<1x32xf32> to vector<8x32xf32>
    %224 = arith.mulf %222, %223 : vector<8x32xf32>
    %225 = vector.broadcast %204 : vector<1x32xf32> to vector<8x32xf32>
    %226 = arith.addf %224, %225 : vector<8x32xf32>
    %227 = vector.broadcast %9 : vector<8x1xf32> to vector<8x32xf32>
    %228 = arith.mulf %226, %227 : vector<8x32xf32>
    %c1_138 = arith.constant 1 : index
    %c0_139 = arith.constant 0 : index
    %c0_140 = arith.constant 0 : index
    %229 = vector.load %arg14[%c1_138, %c0_139, %c0_140] : memref<2x32x64xbf16, #tpu.memory_space<vmem>>, vector<1x32x64xbf16>
    %230 = vector.shape_cast %229 : vector<1x32x64xbf16> to vector<32x64xbf16>
    %231 = arith.truncf %228 : vector<8x32xf32> to vector<8x32xbf16>
    %cst_141 = arith.constant dense<0.000000e+00> : vector<8x64xf32>
    %232 = tpu.matmul %231, %230, %cst_141 {dimension_numbers = #tpu.dot_dimension_numbers<[1], [0], [0], [1], [0, 0, 1, 1], [], []>} : vector<8x32xbf16>, vector<32x64xbf16>, vector<8x64xf32> -> vector<8x64xf32>
    %c1_142 = arith.constant 1 : index
    %c0_143 = arith.constant 0 : index
    %c0_144 = arith.constant 0 : index
    %233 = vector.load %arg15[%c1_142, %c0_143, %c0_144] : memref<2x1x64xf32, #tpu.memory_space<vmem>>, vector<1x1x64xf32>
    %234 = vector.shape_cast %233 : vector<1x1x64xf32> to vector<1x64xf32>
    %235 = vector.broadcast %234 : vector<1x64xf32> to vector<8x64xf32>
    %236 = arith.addf %232, %235 : vector<8x64xf32>
    %cst_145 = arith.constant 0.000000e+00 : f32
    %237 = vector.broadcast %cst_145 : f32 to vector<8x64xf32>
    %238 = arith.maximumf %236, %237 : vector<8x64xf32>
    %c1_146 = arith.constant 1 : index
    %c0_147 = arith.constant 0 : index
    %c0_148 = arith.constant 0 : index
    %239 = vector.load %arg16[%c1_146, %c0_147, %c0_148] : memref<2x64x32xbf16, #tpu.memory_space<vmem>>, vector<1x64x32xbf16>
    %240 = vector.shape_cast %239 : vector<1x64x32xbf16> to vector<64x32xbf16>
    %241 = arith.truncf %238 : vector<8x64xf32> to vector<8x64xbf16>
    %cst_149 = arith.constant dense<0.000000e+00> : vector<8x32xf32>
    %242 = tpu.matmul %241, %240, %cst_149 {dimension_numbers = #tpu.dot_dimension_numbers<[1], [0], [0], [1], [0, 0, 1, 1], [], []>} : vector<8x64xbf16>, vector<64x32xbf16>, vector<8x32xf32> -> vector<8x32xf32>
    %c1_150 = arith.constant 1 : index
    %c0_151 = arith.constant 0 : index
    %c0_152 = arith.constant 0 : index
    %243 = vector.load %arg17[%c1_150, %c0_151, %c0_152] : memref<2x1x32xf32, #tpu.memory_space<vmem>>, vector<1x1x32xf32>
    %244 = vector.shape_cast %243 : vector<1x1x32xf32> to vector<1x32xf32>
    %245 = vector.broadcast %244 : vector<1x32xf32> to vector<8x32xf32>
    %246 = arith.addf %242, %245 : vector<8x32xf32>
    %247 = arith.addf %246, %228 : vector<8x32xf32>
    %c1_153 = arith.constant 1 : index
    %c0_154 = arith.constant 0 : index
    %c0_155 = arith.constant 0 : index
    %248 = vector.load %arg18[%c1_153, %c0_154, %c0_155] : memref<2x1x32xf32, #tpu.memory_space<vmem>>, vector<1x1x32xf32>
    %249 = vector.shape_cast %248 : vector<1x1x32xf32> to vector<1x32xf32>
    %c1_156 = arith.constant 1 : index
    %c0_157 = arith.constant 0 : index
    %c0_158 = arith.constant 0 : index
    %250 = vector.load %arg19[%c1_156, %c0_157, %c0_158] : memref<2x1x32xf32, #tpu.memory_space<vmem>>, vector<1x1x32xf32>
    %251 = vector.shape_cast %250 : vector<1x1x32xf32> to vector<1x32xf32>
    %cst_159 = arith.constant dense<0.000000e+00> : vector<8xf32>
    %252 = vector.multi_reduction <add>, %247, %cst_159 [1] : vector<8x32xf32> to vector<8xf32>
    %253 = vector.shape_cast %252 : vector<8xf32> to vector<8x1xf32>
    %cst_160 = arith.constant 3.200000e+01 : f32
    %254 = vector.broadcast %cst_160 : f32 to vector<8x1xf32>
    %255 = arith.divf %253, %254 : vector<8x1xf32>
    %256 = vector.broadcast %255 : vector<8x1xf32> to vector<8x32xf32>
    %257 = arith.subf %247, %256 : vector<8x32xf32>
    %258 = arith.mulf %257, %257 : vector<8x32xf32>
    %cst_161 = arith.constant dense<0.000000e+00> : vector<8xf32>
    %259 = vector.multi_reduction <add>, %258, %cst_161 [1] : vector<8x32xf32> to vector<8xf32>
    %260 = vector.shape_cast %259 : vector<8xf32> to vector<8x1xf32>
    %cst_162 = arith.constant 3.200000e+01 : f32
    %261 = vector.broadcast %cst_162 : f32 to vector<8x1xf32>
    %262 = arith.divf %260, %261 : vector<8x1xf32>
    %263 = vector.broadcast %255 : vector<8x1xf32> to vector<8x32xf32>
    %264 = arith.subf %247, %263 : vector<8x32xf32>
    %cst_163 = arith.constant 9.99999974E-6 : f32
    %265 = vector.broadcast %cst_163 : f32 to vector<8x1xf32>
    %266 = arith.addf %262, %265 : vector<8x1xf32>
    %267 = math.rsqrt %266 : vector<8x1xf32>
    %268 = vector.broadcast %267 : vector<8x1xf32> to vector<8x32xf32>
    %269 = arith.mulf %264, %268 : vector<8x32xf32>
    %270 = vector.broadcast %249 : vector<1x32xf32> to vector<8x32xf32>
    %271 = arith.mulf %269, %270 : vector<8x32xf32>
    %272 = vector.broadcast %251 : vector<1x32xf32> to vector<8x32xf32>
    %273 = arith.addf %271, %272 : vector<8x32xf32>
    %274 = vector.broadcast %9 : vector<8x1xf32> to vector<8x32xf32>
    %275 = arith.mulf %273, %274 : vector<8x32xf32>
    %c0_164 = arith.constant 0 : index
    %c0_165 = arith.constant 0 : index
    %c0_166 = arith.constant 0 : index
    %276 = vector.load %arg20[%c0_164, %c0_165, %c0_166] : memref<1x8x32xf32, #tpu.memory_space<vmem>>, vector<1x8x32xf32>
    %277 = vector.shape_cast %276 : vector<1x8x32xf32> to vector<8x32xf32>
    %278 = vector.shape_cast %275 : vector<8x32xf32> to vector<1x8x32xf32>
    tpu.vector_store %arg20[%c0_164, %c0_165, %c0_166], %278 {strides = array<i32>} : memref<1x8x32xf32, #tpu.memory_space<vmem>>, vector<1x8x32xf32>,
    return
  }
  func.func @transform_0(%arg0: i32) -> (i32, i32, i32) {
    %c0_i32 = arith.constant 0 : i32
    %c0_i32_0 = arith.constant 0 : i32
    %c0_i32_1 = arith.constant 0 : i32
    return %arg0, %c0_i32, %c0_i32_0 : i32, i32, i32
  }
  func.func @transform_1(%arg0: i32) -> (i32, i32, i32) {
    %c0_i32 = arith.constant 0 : i32
    %c0_i32_0 = arith.constant 0 : i32
    %c0_i32_1 = arith.constant 0 : i32
    return %arg0, %c0_i32, %c0_i32_0 : i32, i32, i32
  }
  func.func @transform_2(%arg0: i32) -> (i32, i32, i32) {
    %c0_i32 = arith.constant 0 : i32
    %c0_i32_0 = arith.constant 0 : i32
    %c0_i32_1 = arith.constant 0 : i32
    return %arg0, %c0_i32, %c0_i32_0 : i32, i32, i32
  }
  func.func @transform_3(%arg0: i32) -> (i32, i32, i32, i32) {
    %c0_i32 = arith.constant 0 : i32
    %c0_i32_0 = arith.constant 0 : i32
    %c0_i32_1 = arith.constant 0 : i32
    %c0_i32_2 = arith.constant 0 : i32
    %c0_i32_3 = arith.constant 0 : i32
    return %c0_i32, %c0_i32_0, %c0_i32_1, %c0_i32_2 : i32, i32, i32, i32
  }
  func.func @transform_4(%arg0: i32) -> (i32, i32, i32, i32) {
    %c0_i32 = arith.constant 0 : i32
    %c0_i32_0 = arith.constant 0 : i32
    %c0_i32_1 = arith.constant 0 : i32
    %c0_i32_2 = arith.constant 0 : i32
    %c0_i32_3 = arith.constant 0 : i32
    return %c0_i32, %c0_i32_0, %c0_i32_1, %c0_i32_2 : i32, i32, i32, i32
  }
  func.func @transform_5(%arg0: i32) -> (i32, i32, i32, i32) {
    %c0_i32 = arith.constant 0 : i32
    %c0_i32_0 = arith.constant 0 : i32
    %c0_i32_1 = arith.constant 0 : i32
    %c0_i32_2 = arith.constant 0 : i32
    %c0_i32_3 = arith.constant 0 : i32
    return %c0_i32, %c0_i32_0, %c0_i32_1, %c0_i32_2 : i32, i32, i32, i32
  }
  func.func @transform_6(%arg0: i32) -> (i32, i32, i32, i32) {
    %c0_i32 = arith.constant 0 : i32
    %c0_i32_0 = arith.constant 0 : i32
    %c0_i32_1 = arith.constant 0 : i32
    %c0_i32_2 = arith.constant 0 : i32
    %c0_i32_3 = arith.constant 0 : i32
    return %c0_i32, %c0_i32_0, %c0_i32_1, %c0_i32_2 : i32, i32, i32, i32
  }
  func.func @transform_7(%arg0: i32) -> (i32, i32, i32, i32) {
    %c0_i32 = arith.constant 0 : i32
    %c0_i32_0 = arith.constant 0 : i32
    %c0_i32_1 = arith.constant 0 : i32
    %c0_i32_2 = arith.constant 0 : i32
    %c0_i32_3 = arith.constant 0 : i32
    return %c0_i32, %c0_i32_0, %c0_i32_1, %c0_i32_2 : i32, i32, i32, i32
  }
  func.func @transform_8(%arg0: i32) -> (i32, i32, i32, i32) {
    %c0_i32 = arith.constant 0 : i32
    %c0_i32_0 = arith.constant 0 : i32
    %c0_i32_1 = arith.constant 0 : i32
    %c0_i32_2 = arith.constant 0 : i32
    %c0_i32_3 = arith.constant 0 : i32
    return %c0_i32, %c0_i32_0, %c0_i32_1, %c0_i32_2 : i32, i32, i32, i32
  }
  func.func @transform_9(%arg0: i32) -> (i32, i32, i32, i32) {
    %c0_i32 = arith.constant 0 : i32
    %c0_i32_0 = arith.constant 0 : i32
    %c0_i32_1 = arith.constant 0 : i32
    %c0_i32_2 = arith.constant 0 : i32
    %c0_i32_3 = arith.constant 0 : i32
    return %c0_i32, %c0_i32_0, %c0_i32_1, %c0_i32_2 : i32, i32, i32, i32
  }
  func.func @transform_10(%arg0: i32) -> (i32, i32, i32) {
    %c0_i32 = arith.constant 0 : i32
    %c0_i32_0 = arith.constant 0 : i32
    %c0_i32_1 = arith.constant 0 : i32
    %c0_i32_2 = arith.constant 0 : i32
    return %c0_i32, %c0_i32_0, %c0_i32_1 : i32, i32, i32
  }
  func.func @transform_11(%arg0: i32) -> (i32, i32, i32) {
    %c0_i32 = arith.constant 0 : i32
    %c0_i32_0 = arith.constant 0 : i32
    %c0_i32_1 = arith.constant 0 : i32
    %c0_i32_2 = arith.constant 0 : i32
    return %c0_i32, %c0_i32_0, %c0_i32_1 : i32, i32, i32
  }
  func.func @transform_12(%arg0: i32) -> (i32, i32, i32) {
    %c0_i32 = arith.constant 0 : i32
    %c0_i32_0 = arith.constant 0 : i32
    %c0_i32_1 = arith.constant 0 : i32
    %c0_i32_2 = arith.constant 0 : i32
    return %c0_i32, %c0_i32_0, %c0_i32_1 : i32, i32, i32
  }
  func.func @transform_13(%arg0: i32) -> (i32, i32, i32) {
    %c0_i32 = arith.constant 0 : i32
    %c0_i32_0 = arith.constant 0 : i32
    %c0_i32_1 = arith.constant 0 : i32
    %c0_i32_2 = arith.constant 0 : i32
    return %c0_i32, %c0_i32_0, %c0_i32_1 : i32, i32, i32
  }
  func.func @transform_14(%arg0: i32) -> (i32, i32, i32) {
    %c0_i32 = arith.constant 0 : i32
    %c0_i32_0 = arith.constant 0 : i32
    %c0_i32_1 = arith.constant 0 : i32
    %c0_i32_2 = arith.constant 0 : i32
    return %c0_i32, %c0_i32_0, %c0_i32_1 : i32, i32, i32
  }
  func.func @transform_15(%arg0: i32) -> (i32, i32, i32) {
    %c0_i32 = arith.constant 0 : i32
    %c0_i32_0 = arith.constant 0 : i32
    %c0_i32_1 = arith.constant 0 : i32
    %c0_i32_2 = arith.constant 0 : i32
    return %c0_i32, %c0_i32_0, %c0_i32_1 : i32, i32, i32
  }
  func.func @transform_16(%arg0: i32) -> (i32, i32, i32) {
    %c0_i32 = arith.constant 0 : i32
    %c0_i32_0 = arith.constant 0 : i32
    %c0_i32_1 = arith.constant 0 : i32
    %c0_i32_2 = arith.constant 0 : i32
    return %c0_i32, %c0_i32_0, %c0_i32_1 : i32, i32, i32
  }
  func.func @transform_17(%arg0: i32) -> (i32, i32, i32) {
    %c0_i32 = arith.constant 0 : i32
    %c0_i32_0 = arith.constant 0 : i32
    %c0_i32_1 = arith.constant 0 : i32
    %c0_i32_2 = arith.constant 0 : i32
    return %c0_i32, %c0_i32_0, %c0_i32_1 : i32, i32, i32
  }
  func.func @transform_18(%arg0: i32) -> (i32, i32, i32) {
    %c0_i32 = arith.constant 0 : i32
    %c0_i32_0 = arith.constant 0 : i32
    %c0_i32_1 = arith.constant 0 : i32
    %c0_i32_2 = arith.constant 0 : i32
    return %c0_i32, %c0_i32_0, %c0_i32_1 : i32, i32, i32
  }
  func.func @transform_19(%arg0: i32) -> (i32, i32, i32) {
    %c0_i32 = arith.constant 0 : i32
    %c0_i32_0 = arith.constant 0 : i32
    %c0_i32_1 = arith.constant 0 : i32
    return %arg0, %c0_i32, %c0_i32_0 : i32, i32, i32
  }
}

</mosaic_0001>

<bundles_post_ra>
// kernel: tpu_custom_call.1
= control target key start
LH: loop header
LB: loop body
LE: loop exit
PB: predicated region body
PF: predicated region fallthrough
CT: control target
= control target key end

     0   :  { %s5848_s0 = inlined_call_operand.vmem [shape: f32[2,8,32], index: 0, kind: input, shape index: {}]   ;;  %s5849_s1 = inlined_call_operand.vmem [shape: f32[2,1,8], index: 1, kind: input, shape index: {}]   ;;  %s5850_s2 = inlined_call_operand.vmem [shape: f32[2,8,1], index: 2, kind: input, shape index: {}]   ;;  %s5851_s3 = inlined_call_operand.vmem [shape: bf16[2,4,32,8], index: 3, kind: input, shape index: {}]   ;;  %s5852_s4 = inlined_call_operand.vmem [shape: f32[2,4,1,8], index: 4, kind: input, shape index: {}]   ;;  %s5853_s5 = inlined_call_operand.vmem [shape: bf16[2,4,32,8], index: 5, kind: input, shape index: {}]   ;;  %s5854_s6 = inlined_call_operand.vmem [shape: f32[2,4,1,8], index: 6, kind: input, shape index: {}]   ;;  %s5855_s7 = inlined_call_operand.vmem [shape: bf16[2,4,32,8], index: 7, kind: input, shape index: {}]   ;;  %s5856_s8 = inlined_call_operand.vmem [shape: f32[2,4,1,8], index: 8, kind: input, shape index: {}]   ;;  %s5857_s9 = inlined_call_operand.vmem [shape: bf16[2,4,8,32], index: 9, kind: input, shape index: {}]   ;;  %s5858_s10 = inlined_call_operand.vmem [shape: f32[2,1,32], index: 10, kind: input, shape index: {}]   ;;  %s5859_s11 = inlined_call_operand.vmem [shape: f32[2,1,32], index: 11, kind: input, shape index: {}]   ;;  %s5860_s12 = inlined_call_operand.vmem [shape: f32[2,1,32], index: 12, kind: input, shape index: {}]   ;;  %s5861_s13 = inlined_call_operand.vmem [shape: bf16[2,32,64], index: 13, kind: input, shape index: {}]   ;;  %s5862_s14 = inlined_call_operand.vmem [shape: f32[2,1,64], index: 14, kind: input, shape index: {}]   ;;  %s5863_s15 = inlined_call_operand.vmem [shape: bf16[2,64,32], index: 15, kind: input, shape index: {}]   ;;  %s5864_s16 = inlined_call_operand.vmem [shape: f32[2,1,32], index: 16, kind: input, shape index: {}]   ;;  %s5865_s17 = inlined_call_operand.vmem [shape: f32[2,1,32], index: 17, kind: input, shape index: {}]   ;;  %s5866_s18 = inlined_call_operand.vmem [shape: f32[2,1,32], index: 18, kind: input, shape index: {}]   ;;  %s5867_s19 = inlined_call_operand.hbm [shape: f32[2,8,32], index: 19, kind: output, shape index: {}]  }
   0x1   :  { %5874 = sst [smem:[#allocation10_spill]] %s5848_s0 }
   0x2   :  { %5875 = sst [smem:[#allocation11_spill]] %s5849_s1 }
   0x3   :  { %5876 = sst [smem:[#allocation12_spill]] %s5850_s2 }
   0x4   :  { %5877 = sst [smem:[#allocation13_spill]] %s5851_s3 }
   0x5   :  { %5878 = sst [smem:[#allocation14_spill]] %s5852_s4 }
   0x6   :  { %5879 = sst [smem:[#allocation15_spill]] %s5853_s5 }
   0x7   :  { %24 = vsyncpa [#allocation3], 0 }
   0x8   :  { %26 = vsyncpa [#allocation3 + $0x1], 0  ;;  %s5053_s0 = smov 0   ;;  %s5055_s30 = smov 0  }
   0x9   :  { %s5057_s20 = smov 0   ;;  %s5059_s21 = smov 0  }
   0xa LB: > { %5880 = sst [smem:[#allocation5_spill]] %s4935_s0  ;;  %s5074_s1 = sadd.s32 4294967295, %s4947_s21   ;;  %s4947_s21 = sphi %s5059_s21, %s5895_s21   ;;  %s4943_s20 = sphi %s5057_s20, %s5897_s20   ;;  %s4939_s30 = sphi %s5055_s30, %s5899_s30   ;;  %s4935_s0 = sphi %s5053_s0, %s5898_s0  }
   0xb   : > { %5881 = sst [smem:[#allocation6_spill]] %s4943_s20  ;;  %s3986_s22 = sadd.s32 4294967294, %s4947_s21  }
   0xc   : > { %s5078_s2 = sadd.s32 1, %s4947_s21   ;;  %s453_s23 = sadd.s32 1, %s4943_s20 }
   0xd   : > { %5882 = sst [smem:[#allocation7_spill]] %s5078_s2  ;;  %s450_s24 = ssub.s32 %s4947_s21, %s5078_s2 }
   0xe   : > { %p463_p0 = scmp.ne.s32.totalorder %s4943_s20, %s4939_s30  ;;  %p451_p1 = scmp.eq.s32.totalorder %s450_s24, 0 }
   0xf   : > { %p464_p2 = scmp.eq.s32.totalorder %s5074_s1, 1  ;;  %p469_p3 = scmp.ne.s32.totalorder %s4939_s30, %s4935_s0 }
  0x10   : > { %p470_p4 = scmp.eq.s32.totalorder %s3986_s22, 1  ;;  %p3989_p7 = scmp.ge.s32.totalorder %s4947_s21, 1 }
  0x11   : > { %s5089_s25 = scalar_select %p451_p1, %s4943_s20, %s453_s23  }
  0x12   : > { %p5091_p5 = por %p464_p2, %p463_p0  ;;  %p5095_p6 = por %p470_p4, %p469_p3 }
  0x13   : > { %5883 = sst [smem:[#allocation8_spill]] %s5089_s25  ;;  %p556_p8 = scmp.lt.s32.totalorder %s4947_s21, 3 }
  0x14   : > { %s5885_s26 = scalar_select %p5095_p6, 1, 0 }
  0x15   : > { %p557_p9 = pnand %p3989_p7, %p556_p8 }
  0x16   : > { %5886 = sst [smem:[#allocation9_spill]] %s5885_s26  ;;  %s5887_s29 = sld [smem:[#allocation13_spill]] (!%p557_p9)  ;;  %v4949_v1 = vmov (!%p557_p9), 0.0   ;;  %vm4950_vm0 = vmmov (!%p557_p9), 0   ;;  %vm692_vm1 = vcmask (!%p557_p9), 261120   ;;  %v4801_v16 = vld [vmem:[%s5855_s7] sm:$0xff] (!%p557_p9)  }
  0x17   : > { %560 = sbr.rel (%p557_p9) target bundleno = 4623 (0x120f), region = 96  ;;  %4366 = vmatprep.subr.bf16.mxu1 (!%p557_p9), %v4949_v1  ;;  %4382 = vmatprep.subr.bf16.mxu0 (!%p557_p9), %v4949_v1  ;;  %p618_p10 = scmp.lt.s32.totalorder (!%p557_p9), %s5074_s1, 1  ;;  %v4802_v18 = vld [vmem:[%s5855_s7 + $0x8] sm:$0xff] (!%p557_p9)   ;;  %v4803_v21 = vld [vmem:[%s5855_s7 + $0x20] sm:$0xff] (!%p557_p9)   ;;  %v4805_v23 = vld [vmem:[%s5855_s7 + $0x10] sm:$0xff] (!%p557_p9)   ;;  %vm1414_vm2 = vcmask (!%p557_p9), 64512  }
  0x18   : > { %4370 = vmatprep.mubr.msk.bf16.mxu1 (!%p557_p9), %vm4950_vm0, %v4949_v1  ;;  %4386 = vmatprep.mubr.msk.bf16.mxu0 (!%p557_p9), %vm4950_vm0, %v4949_v1  ;;  %s5888_s28 = sld [smem:[#allocation10_spill]] (!%p557_p9)  ;;  %s5889_s5 = sld [smem:[#allocation15_spill]] (!%p557_p9)  ;;  %v4804_v22 = vld [vmem:[%s5855_s7 + $0x28] sm:$0xff] (!%p557_p9)   ;;  %v4806_v24 = vld [vmem:[%s5855_s7 + $0x18] sm:$0xff] (!%p557_p9)   ;;  %v4807_v25 = vld [vmem:[%s5855_s7 + $0x30] sm:$0xff] (!%p557_p9)   ;;  %vm1654_vm3 = vcmask (!%p557_p9), 1043456  }
  0x19   : > { %v4808_v26 = vld [vmem:[%s5855_s7 + $0x38] sm:$0xff] (!%p557_p9)   ;;  %v4009_v35 = vld [vmem:[%s5854_s6] ss:$0 sm:$0xff] (!%p557_p9)  ;;  %s5890_s4 = sld [smem:[#allocation14_spill]] (!%p557_p9)  ;;  %v4011_v49 = vld [vmem:[%s5854_s6 + $0x2] ss:$0 sm:$0xff] (!%p557_p9) }
  0x1a   : > { %s5891_s0 = sld [smem:[#allocation11_spill]] (!%p557_p9)  ;;  %s5892_s26 = sld [smem:[#allocation12_spill]] (!%p557_p9)  ;;  %vm2188_vm4 = vcmask (!%p557_p9), 523264  }
  0x1c   : > { %v4785_v0 = vld [vmem:[%s5887_s29] sm:$0xff] (!%p557_p9)   ;;  %v4787_v3 = vld [vmem:[%s5887_s29 + $0x8] sm:$0xff] (!%p557_p9)   ;;  %v4789_v5 = vld [vmem:[%s5887_s29 + $0x10] sm:$0xff] (!%p557_p9)  }
  0x1d   : > { %v4786_v2 = vld [vmem:[%s5887_s29 + $0x20] sm:$0xff] (!%p557_p9)   ;;  %4367 = vmatpush3.bf16.msra.mxu1 (!%p557_p9), %v4785_v0  ;;  %v4788_v4 = vld [vmem:[%s5887_s29 + $0x28] sm:$0xff] (!%p557_p9)   ;;  %v4791_v9 = vld [vmem:[%s5887_s29 + $0x18] sm:$0xff] (!%p557_p9)  }
  0x1e   : > { %4383 = vmatpush3.bf16.msra.mxu0 %v4786_v2  ;;  %4368 = vmatprep.subr.bf16.mxu1 %v4949_v1  ;;  %s5123_s22 = scalar_select %p618_p10, %s5074_s1, 1  ;;  %v4790_v6 = vld [vmem:[%s5889_s5] sm:$0xff]   ;;  %v4792_v10 = vld [vmem:[%s5889_s5 + $0x8] sm:$0xff]   ;;  %v4793_v11 = vld [vmem:[%s5887_s29 + $0x30] sm:$0xff]  }
  0x1f   : > { %4384 = vmatprep.subr.bf16.mxu0 %v4949_v1  ;;  %v4794_v12 = vld [vmem:[%s5889_s5 + $0x20] sm:$0xff]   ;;  %v4795_v13 = vld [vmem:[%s5887_s29 + $0x38] sm:$0xff]   ;;  %v4796_v14 = vld [vmem:[%s5889_s5 + $0x28] sm:$0xff]  }
  0x20   : > { %s3991_s25 = sshll.u32 %s5123_s22, 3  ;;  %v4797_v15 = vld [vmem:[%s5889_s5 + $0x10] sm:$0xff]   ;;  %v4798_v17 = vld [vmem:[%s5889_s5 + $0x18] sm:$0xff]   ;;  %v3993_v36 = vld [vmem:[%s5890_s4] ss:$0 sm:$0xff] }
  0x21   : > { %4369 = vmatpush3.bf16.msra.mxu1 %v4787_v3  ;;  %s621_s2 = scalar_lea.vmem %s5888_s28, %s3991_s25  ;;  %v4799_v19 = vld [vmem:[%s5889_s5 + $0x30] sm:$0xff]   ;;  %v4800_v20 = vld [vmem:[%s5889_s5 + $0x38] sm:$0xff]   ;;  %v3995_v51 = vld [vmem:[%s5890_s4 + $0x2] ss:$0 sm:$0xff]  ;;  %s628_s24 = scalar_lea.vmem %s5892_s26, %s3991_s25 }
  0x22   : > { %4385 = vmatpush3.bf16.msra.mxu0 %v4788_v4  ;;  %4374 = vmatprep.subr.bf16.mxu1 %v4949_v1  ;;  %v5138_v7 = vld [vmem:[%s621_s2] sm:$0xff]  ;;  %s624_s2 = scalar_lea.vmem %s5891_s0, %s5123_s22  ;;  %s615_s0 = sand.u32 1, %s4939_s30  }
  0x23   : > { %4398 = vmatprep.subr.bf16.mxu0 %v4949_v1  ;;  %v5143_v8 = vpack.c.bf16 %v5138_v7, %v5138_v7  ;;  %v4010_v2 = vld [vmem:[%s5854_s6 + $0x1] ss:$0 sm:$0xff]  ;;  %s4227_s22 = sshll.u32 %s5074_s1, 7  ;;  %s3893_s26 = scalar_lea.sflag [#allocation3], %s615_s0 }
  0x24   : > { %v3994_v4 = vld [vmem:[%s5890_s4 + $0x1] ss:$0 sm:$0xff]  ;;  %s4952_s1 = smov [#allocation2]  }
  0x25   : > { %4371 = vmatmul.mubr.msk.bf16.vlgmr.msra.gmra.mrb[0].mxu1 %vm692_vm1, %v5143_v8  ;;  %4387 = vmatmul.mubr.msk.bf16.vlgmr.msra.gmra.mrb[0].mxu0 %vm692_vm1, %v5143_v8 }
  0x26   : > { %4375 = vmatpush3.bf16.msra.mxu1 %v4789_v5  ;;  %4399 = vmatpush3.bf16.msra.mxu0 %v4790_v6  ;;  %v4025_v6 = vld [vmem:[%s5856_s8] ss:$0 sm:$0xff] }
  0x27   : > { %4376 = vmatprep.subr.bf16.mxu1 %v4949_v1  ;;  %4400 = vmatprep.subr.bf16.mxu0 %v4949_v1 }
  0x28   : > { %4378 = vmatprep.mubr.msk.bf16.mxu1 %vm4950_vm0, %v4949_v1  ;;  %4402 = vmatprep.mubr.msk.bf16.mxu0 %vm4950_vm0, %v4949_v1 }
  0x2a   : > { %4377 = vmatpush3.bf16.msra.mxu1 %v4791_v9  ;;  %4401 = vmatpush3.bf16.msra.mxu0 %v4792_v10 }
  0x2b   : > { %4390 = vmatprep.subr.bf16.mxu1 %v4949_v1  ;;  %4414 = vmatprep.subr.bf16.mxu0 %v4949_v1 }
  0x2d   : > { %4379 = vmatmul.mubr.msk.bf16.vlgmr.msra.gmra.mrb[4].mxu1 %vm692_vm1, %v5143_v8  ;;  %4403 = vmatmul.mubr.msk.bf16.vlgmr.msra.gmra.mrb[4].mxu0 %vm692_vm1, %v5143_v8 }
  0x2e   : > { %4391 = vmatpush3.bf16.msra.mxu1 %v4793_v11  ;;  %4415 = vmatpush3.bf16.msra.mxu0 %v4794_v12 }
  0x2f   : > { %4392 = vmatprep.subr.bf16.mxu1 %v4949_v1  ;;  %4416 = vmatprep.subr.bf16.mxu0 %v4949_v1 }
  0x30   : > { %4394 = vmatprep.mubr.msk.bf16.mxu1 %vm4950_vm0, %v4949_v1  ;;  %4418 = vmatprep.mubr.msk.bf16.mxu0 %vm4950_vm0, %v4949_v1 }
  0x32   : > { %4393 = vmatpush3.bf16.msra.mxu1 %v4795_v13  ;;  %4417 = vmatpush3.bf16.msra.mxu0 %v4796_v14 }
  0x33   : > { %4406 = vmatprep.subr.bf16.mxu1 %v4949_v1  ;;  %4430 = vmatprep.subr.bf16.mxu0 %v4949_v1 }
  0x35   : > { %4395 = vmatmul.mubr.msk.bf16.vlgmr.msra.gmra.mrb[8].mxu1 %vm692_vm1, %v5143_v8  ;;  %4419 = vmatmul.mubr.msk.bf16.vlgmr.msra.gmra.mrb[8].mxu0 %vm692_vm1, %v5143_v8 }
  0x36   : > { %4407 = vmatpush3.bf16.msra.mxu1 %v4797_v15  ;;  %4410 = vmatprep.mubr.msk.bf16.mxu1 %vm4950_vm0, %v4949_v1 }
  0x37   : > { %4408 = vmatprep.subr.bf16.mxu1 %v4949_v1  ;;  %4431 = vmatpush3.bf16.msra.mxu0 %v4801_v16 }
  0x38   : > { %4432 = vmatprep.subr.bf16.mxu0 %v4949_v1  ;;  %4434 = vmatprep.mubr.msk.bf16.mxu0 %vm4950_vm0, %v4949_v1 }
  0x3a   : > { %4409 = vmatpush3.bf16.msra.mxu1 %v4798_v17 }
  0x3b   : > { %4422 = vmatprep.subr.bf16.mxu1 %v4949_v1  ;;  %4433 = vmatpush3.bf16.msra.mxu0 %v4802_v18 }
  0x3c   : > { %4446 = vmatprep.subr.bf16.mxu0 %v4949_v1 }
  0x3d   : > { %4411 = vmatmul.mubr.msk.bf16.vlgmr.msra.gmra.mrb[12].mxu1 %vm692_vm1, %v5143_v8 }
  0x3e   : > { %4423 = vmatpush3.bf16.msra.mxu1 %v4799_v19  ;;  %4426 = vmatprep.mubr.msk.bf16.mxu1 %vm4950_vm0, %v4949_v1 }
  0x3f   : > { %4424 = vmatprep.subr.bf16.mxu1 %v4949_v1  ;;  %4435 = vmatmul.mubr.msk.bf16.vlgmr.msra.gmra.mrb[12].mxu0 %vm692_vm1, %v5143_v8 }
  0x40   : > { %4450 = vmatprep.mubr.msk.bf16.mxu0 %vm4950_vm0, %v4949_v1  ;;  %4447 = vmatpush3.bf16.msra.mxu0 %v4803_v21 }
  0x41   : > { %4448 = vmatprep.subr.bf16.mxu0 %v4949_v1 }
  0x42   : > { %4425 = vmatpush3.bf16.msra.mxu1 %v4800_v20 }
  0x43   : > { %4438 = vmatprep.subr.bf16.mxu1 %v4949_v1 }
  0x44   : > { %4449 = vmatpush3.bf16.msra.mxu0 %v4804_v22  ;;  %v4012_v22 = vld [vmem:[%s5854_s6 + $0x3] ss:$0 sm:$0xff] }
  0x45   : > { %4427 = vmatmul.mubr.msk.bf16.vlgmr.msra.gmra.mrb[16].mxu1 %vm692_vm1, %v5143_v8  ;;  %4462 = vmatprep.subr.bf16.mxu0 %v4949_v1 }
  0x46   : > { %4442 = vmatprep.mubr.msk.bf16.mxu1 %vm4950_vm0, %v4949_v1  ;;  %4439 = vmatpush3.bf16.msra.mxu1 %v4805_v23 }
  0x47   : > { %4440 = vmatprep.subr.bf16.mxu1 %v4949_v1  ;;  %4451 = vmatmul.mubr.msk.bf16.vlgmr.msra.gmra.mrb[16].mxu0 %vm692_vm1, %v5143_v8 }
  0x48   : > { %4464 = vmatprep.mubr.msk.bf16.mxu0 %vm4950_vm0, %v4949_v1 }
  0x4a   : > { %4441 = vmatpush3.bf16.msra.mxu1 %v4806_v24 }
  0x4b   : > { %4454 = vmatprep.subr.bf16.mxu1 %v4949_v1 }
  0x4d   : > { %4443 = vmatmul.mubr.msk.bf16.vlgmr.msra.gmra.mrb[20].mxu1 %vm692_vm1, %v5143_v8 }
  0x4e   : > { %4458 = vmatprep.mubr.msk.bf16.mxu1 %vm4950_vm0, %v4949_v1  ;;  %4455 = vmatpush3.bf16.msra.mxu1 %v4807_v25  ;;  %v3996_v25 = vld [vmem:[%s5890_s4 + $0x3] ss:$0 sm:$0xff] }
  0x4f   : > { %4456 = vmatprep.subr.bf16.mxu1 %v4949_v1 }
  0x52   : > { %4457 = vmatpush3.bf16.msra.mxu1 %v4808_v26 }
  0x53   : > { %4468 = vmatprep.subr.bf16.mxu1 %v4949_v1 }
  0x55   : > { %4459 = vmatmul.mubr.msk.bf16.vlgmr.msra.gmra.mrb[24].mxu1 %vm692_vm1, %v5143_v8 }
  0x56   : > { %4470 = vmatprep.mubr.msk.bf16.mxu1 %vm4950_vm0, %v4949_v1 }
  0xf8   : > { %v730_v27 = vpop.f32.mrb[0].mxu1  ;;  %v834_v28 = vpop.f32.mrb[0].mxu0 }
  0xf9   : > { %v4372_v29 = vpop.f32.mrb[1].mxu1  ;;  %v4388_v30 = vpop.f32.mrb[1].mxu0  ;;  %v731_v44 = vadd.f32 %v3993_v36, %v730_v27  ;;  %v835_v60 = vadd.f32 %v3995_v51, %v834_v28 }
  0xfa   : > { %v733_v31 = vpop.f32.mrb[2].mxu1  ;;  %v837_v32 = vpop.f32.mrb[2].mxu0 }
  0xfb   : > { %v4373_v33 = vpop.f32.mrb[3].mxu1  ;;  %v4389_v34 = vpop.f32.mrb[3].mxu0  ;;  %v892_v50 = vmul.f32 0.35355338, %v731_v44  ;;  %v894_v3 = vmul.f32 0.35355338, %v835_v60 }
  0xfd   : > { %v1400_v59 = vpack.c.bf16 %v892_v50, %v892_v50  ;;  %v1402_v12 = vpack.c.bf16 %v894_v3, %v894_v3 }
 0x100   : > { %v782_v37 = vpop.f32.mrb[4].mxu1  ;;  %v986_v38 = vpop.f32.mrb[4].mxu0 }
 0x101   : > { %v987_v39 = vadd.f32 %v4009_v35, %v986_v38  ;;  %v4380_v40 = vpop.f32.mrb[5].mxu1  ;;  %v4404_v41 = vpop.f32.mrb[5].mxu0  ;;  %v783_v13 = vadd.f32 %v3994_v4, %v782_v37 }
 0x102   : > { %v785_v42 = vpop.f32.mrb[6].mxu1  ;;  %v989_v43 = vpop.f32.mrb[6].mxu0  ;;  %v4026_v41 = vld [vmem:[%s5856_s8 + $0x1] ss:$0 sm:$0xff] }
 0x103   : > { %v1404_v45 = vpack.c.bf16 %v987_v39, %v987_v39  ;;  %v4381_v46 = vpop.f32.mrb[7].mxu1  ;;  %v4405_v47 = vpop.f32.mrb[7].mxu0  ;;  %v893_v23 = vmul.f32 0.35355338, %v783_v13 }
 0x105   : > { %v1419_v48 = vsel %vm1414_vm2, %v1404_v45, 0  ;;  %v1401_v30 = vpack.c.bf16 %v893_v23, %v893_v23 }
 0x106   : > { %4463 = vmatpush3.bf16.xpose.msra.mxu0 %v1419_v48 }
 0x107   : > { %4474 = vmatprep.subr.bf16.mxu0 %v4949_v1 }
 0x108   : > { %v886_v52 = vpop.f32.mrb[8].mxu1  ;;  %v1090_v53 = vpop.f32.mrb[8].mxu0 }
 0x109   : > { %v1091_v54 = vadd.f32 %v4011_v49, %v1090_v53  ;;  %v4396_v55 = vpop.f32.mrb[9].mxu1  ;;  %v4420_v56 = vpop.f32.mrb[9].mxu0  ;;  %v887_v31 = vadd.f32 %v3996_v25, %v886_v52  ;;  %v1409_v53 = vlaneseq }
 0x10a   : > { %v889_v57 = vpop.f32.mrb[10].mxu1  ;;  %v1093_v58 = vpop.f32.mrb[10].mxu0  ;;  %v631_v55 = vld [vmem:[%s624_s2] sm:$0x1]  ;;  %s3990_s2 = sshll.u32 %s615_s0, 3 }
 0x10b   : > { %v1406_v61 = vpack.c.bf16 %v1091_v54, %v1091_v54  ;;  %v4397_v62 = vpop.f32.mrb[11].mxu1  ;;  %v4421_v63 = vpop.f32.mrb[11].mxu0  ;;  %v895_v35 = vmul.f32 0.35355338, %v887_v31  ;;  %v1410_v54 = vshrl.u32 %v1409_v53, 7  ;;  %s617_s25 = scalar_lea.vmem [#allocation2], %s3990_s2 }
 0x10c   : > { %v632_v56 = vmul.f32 -1e+30, %v631_v55  ;;  %s3906_s20 = sshll.u32 %s617_s25, 4  ;;  %s4889_s2 = sshll.u32 %s4952_s1, 4  ;;  %s5807_s20 = int_to_ptr.vmem [resolvable:$true] %s3906_s20  ;;  %s4890_s2 = int_to_ptr.vmem [resolvable:$false] %s4889_s2 }
 0x10d   : > { %v1511_v0 = vsel %vm1414_vm2, %v1406_v61, 0  ;;  %4465 = vmatmul.mubr.msk.bf16.vlgmr.msra.gmra.mrb[20].mxu0 %vm1414_vm2, %v1400_v59  ;;  %v1403_v36 = vpack.c.bf16 %v895_v35, %v895_v35  ;;  %v1411_v57 = vsub.s32 0, %v1410_v54  ;;  %v4028_v54 = vld [vmem:[%s5856_s8 + $0x3] ss:$0 sm:$0xff]  ;;  %s4891_s27 = scalar_lea.vmem %s4890_s2, 256  ;;  %p4892_p0 = scmp.lt.s32.totalorder %s5807_s20, %s4890_s2 }
 0x10e   : > { %4475 = vmatpush3.bf16.xpose.msra.mxu0 %v1511_v0  ;;  %4476 = vmatprep.mubr.msk.bf16.mxu0 %vm4950_vm0, %v4949_v1 }
 0x10f   : > { %4486 = vmatprep.subr.bf16.mxu0 %v4949_v1  ;;  %v5329_v58 = vrot.slane %v632_v56, %v1411_v57 }
 0x110   : > { %v1038_v5 = vpop.f32.mrb[12].mxu1 }
 0x111   : > { %v1039_v8 = vadd.f32 %v4010_v2, %v1038_v5  ;;  %v4412_v9 = vpop.f32.mrb[13].mxu1 }
 0x112   : > { %v1041_v10 = vpop.f32.mrb[14].mxu1  ;;  %v1238_v11 = vpop.f32.mrb[12].mxu0 }
 0x113   : > { %v1405_v14 = vpack.c.bf16 %v1039_v8, %v1039_v8  ;;  %v4413_v15 = vpop.f32.mrb[15].mxu1  ;;  %v1239_v16 = vadd.f32 %v4025_v6, %v1238_v11  ;;  %v4436_v17 = vpop.f32.mrb[13].mxu0 }
 0x114   : > { %v1241_v18 = vpop.f32.mrb[14].mxu0 }
 0x115   : > { %v1465_v19 = vsel %vm1414_vm2, %v1405_v14, 0  ;;  %4477 = vmatmul.mubr.msk.bf16.vlgmr.msra.gmra.mrb[24].mxu0 %vm1414_vm2, %v1402_v12  ;;  %v1647_v20 = vpack.c.bf16 %v1239_v16, %v1239_v16  ;;  %v4437_v21 = vpop.f32.mrb[15].mxu0 }
 0x116   : > { %4469 = vmatpush3.bf16.xpose.msra.mxu1 %v1465_v19  ;;  %4488 = vmatprep.mubr.msk.bf16.mxu0 %vm4950_vm0, %v4949_v1 }
 0x117   : > { %4480 = vmatprep.subr.bf16.mxu1 %v4949_v1  ;;  %v1656_v24 = vsel %vm1654_vm3, %v1647_v20, 0 }
 0x118   : > { %v1142_v26 = vpop.f32.mrb[16].mxu1  ;;  %4487 = vmatpush3.bf16.msra.mxu0 %v1656_v24 }
 0x119   : > { %v1143_v27 = vadd.f32 %v4012_v22, %v1142_v26  ;;  %v4428_v28 = vpop.f32.mrb[17].mxu1  ;;  %4498 = vmatprep.subr.bf16.mxu0 %v4949_v1 }
 0x11a   : > { %v1145_v29 = vpop.f32.mrb[18].mxu1  ;;  %v5316_v37 = vpop.f32.mrb[16].mxu0 }
 0x11b   : > { %v1407_v32 = vpack.c.bf16 %v1143_v27, %v1143_v27  ;;  %v4429_v33 = vpop.f32.mrb[19].mxu1  ;;  %v4452_v38 = vpop.f32.mrb[17].mxu0 }
 0x11c   : > { %v1345_v39 = vpop.f32.mrb[18].mxu0 }
 0x11d   : > { %v1557_v34 = vsel %vm1414_vm2, %v1407_v32, 0  ;;  %4471 = vmatmul.mubr.msk.bf16.vlgmr.msra.gmra.mrb[28].mxu1 %vm1414_vm2, %v1401_v30  ;;  %v4453_v40 = vpop.f32.mrb[19].mxu0 }
 0x11e   : > { %4481 = vmatpush3.bf16.xpose.msra.mxu1 %v1557_v34  ;;  %4482 = vmatprep.mubr.msk.bf16.mxu1 %vm4950_vm0, %v4949_v1 }
 0x11f   : > { %4492 = vmatprep.subr.bf16.mxu1 %v4949_v1 }
 0x120   : > { %v1290_v42 = vpop.f32.mrb[20].mxu1 }
 0x121   : > { %v1291_v43 = vadd.f32 %v4026_v41, %v1290_v42  ;;  %v4444_v44 = vpop.f32.mrb[21].mxu1 }
 0x122   : > { %v1293_v45 = vpop.f32.mrb[22].mxu1 }
 0x123   : > { %v1648_v46 = vpack.c.bf16 %v1291_v43, %v1291_v43  ;;  %v4445_v47 = vpop.f32.mrb[23].mxu1  ;;  %v4027_v43 = vld [vmem:[%s5856_s8 + $0x2] ss:$0 sm:$0xff] }
 0x124   : > { %v1343_v44 = vadd.f32 %v4027_v43, %v5316_v37 }
 0x125   : > { %4483 = vmatmul.mubr.msk.bf16.vlgmr.msra.gmra.mrb[32].mxu1 %vm1414_vm2, %v1403_v36  ;;  %v1702_v48 = vsel %vm1654_vm3, %v1648_v46, 0 }
 0x126   : > { %4494 = vmatprep.mubr.msk.bf16.mxu1 %vm4950_vm0, %v4949_v1  ;;  %4493 = vmatpush3.bf16.msra.mxu1 %v1702_v48  ;;  %v1649_v47 = vpack.c.bf16 %v1343_v44, %v1343_v44 }
 0x127   : > { %4504 = vmatprep.subr.bf16.mxu1 %v4949_v1 }
 0x128   : > { %v5323_v49 = vpop.f32.mrb[24].mxu1 }
 0x129   : > { %v4460_v50 = vpop.f32.mrb[25].mxu1  ;;  %v1395_v56 = vadd.f32 %v4028_v54, %v5323_v49 }
 0x12a   : > { %v1397_v51 = vpop.f32.mrb[26].mxu1 }
 0x12b   : > { %v4461_v52 = vpop.f32.mrb[27].mxu1  ;;  %v1748_v51 = vsel %vm1654_vm3, %v1649_v47, 0 }
 0x1e0   : > { %v1455_v59 = vpop.f32.mrb[20].mxu0 }
 0x1e1   : > { %v1456_v60 = vadd.f32 %v1455_v59, %v5329_v58  ;;  %v4466_v61 = vpop.f32.mrb[21].mxu0 }
 0x1e2   : > { %v1458_v62 = vpop.f32.mrb[22].mxu0 }
 0x1e3   : > { %v4467_v63 = vpop.f32.mrb[23].mxu0  ;;  %v1599_v0 = vsel %vm1414_vm2, %v1456_v60, -inf }
 0x1e4   : > { %1600 = vmax.xlane.f32.xlu0 %v1599_v0 }
 0x1e8   : > { %v1547_v2 = vpop.f32.mrb[24].mxu0 }
 0x1e9   : > { %v1548_v3 = vadd.f32 %v1547_v2, %v5329_v58  ;;  %v4478_v4 = vpop.f32.mrb[25].mxu0 }
 0x1ea   : > { %v1550_v5 = vpop.f32.mrb[26].mxu0 }
 0x1eb   : > { %v4479_v6 = vpop.f32.mrb[27].mxu0  ;;  %v1605_v8 = vsel %vm1414_vm2, %v1548_v3, -inf  ;;  %v1837_v5 = vld [vmem:[%s5857_s9 + $0x4] sm:$0xf] }
 0x1ec   : > { %1606 = vmax.xlane.f32.xlu1 %v1605_v8  ;;  %v1894_v6 = vsel %vm1654_vm3, %v1837_v5, 0  ;;  %v1838_v8 = vld [vmem:[%s5857_s9 + $0x8] sm:$0xf] }
 0x1ed   : > { %v4810_v5 = vld [vmem:[%s5861_s13 + $0x8] sm:$0xff]  }
 0x1f0   : > { %v1501_v9 = vpop.f32.mrb[28].mxu1 }
 0x1f1   : > { %v1502_v10 = vadd.f32 %v1501_v9, %v5329_v58  ;;  %v4472_v11 = vpop.f32.mrb[29].mxu1 }
 0x1f2   : > { %v1504_v12 = vpop.f32.mrb[30].mxu1 }
 0x1f3   : > { %v4473_v13 = vpop.f32.mrb[31].mxu1  ;;  %v1602_v14 = vsel %vm1414_vm2, %v1502_v10, -inf  ;;  %v1940_v12 = vsel %vm1654_vm3, %v1838_v8, 0  ;;  %v4812_v8 = vld [vmem:[%s5863_s15 + $0x8] sm:$0xff]  }
 0x1f4   : > { %1603 = vmax.xlane.f32.xlu0 %v1602_v14 }
 0x1f8   : > { %v1593_v15 = vpop.f32.mrb[32].mxu1 }
 0x1f9   : > { %v1594_v16 = vadd.f32 %v1593_v15, %v5329_v58  ;;  %v4484_v17 = vpop.f32.mrb[33].mxu1 }
 0x1fa   : > { %v1596_v18 = vpop.f32.mrb[34].mxu1 }
 0x1fb   : > { %v4485_v19 = vpop.f32.mrb[35].mxu1  ;;  %v1608_v20 = vsel %vm1414_vm2, %v1594_v16, -inf }
 0x1fc   : > { %1609 = vmax.xlane.f32.xlu1 %v1608_v20  ;;  %v1839_v20 = vld [vmem:[%s5857_s9 + $0xc] sm:$0xf] }
 0x271   : > { %v1601_v21 = vpop.xlane.xlu0 %1600 }
 0x272   : > { %v1611_v22 = vsub.f32 %v1456_v60, %v1601_v21  ;;  %v1650_v60 = vpack.c.bf16 %v1395_v56, %v1395_v56 }
 0x274   : > { %v1615_v23 = vmul.f32 1.442695, %v1611_v22  ;;  %v1794_v63 = vsel %vm1654_vm3, %v1650_v60, 0 }
 0x276   : > { %4845 = vpow2.f32 %v1615_v23 }
 0x279   : > { %v1607_v24 = vpop.xlane.xlu1 %1606 }
 0x27a   : > { %v1613_v25 = vsub.f32 %v1548_v3, %v1607_v24  ;;  %v1836_v3 = vld [vmem:[%s5857_s9] sm:$0xf]  ;;  %v1986_v24 = vsel %vm1654_vm3, %v1839_v20, 0 }
 0x27b   : > { %v1848_v4 = vsel %vm1654_vm3, %v1836_v3, 0 }
 0x27c   : > { %v1619_v26 = vmul.f32 1.442695, %v1613_v25 }
 0x27e   : > { %4847 = vpow2.f32 %v1619_v26 }
 0x280   : > { %v4846_v27 = vpop.eup %4845 }
 0x281   : > { %v1604_v28 = vpop.xlane.xlu0 %1603  ;;  %v1623_v29 = vsel %vm1414_vm2, %v4846_v27, 0.0 }
 0x282   : > { %v1612_v30 = vsub.f32 %v1502_v10, %v1604_v28  ;;  %1624 = vadd.xlane.f32.xlu0 %v1623_v29 }
 0x284   : > { %v1617_v31 = vmul.f32 1.442695, %v1612_v30 }
 0x286   : > { %4849 = vpow2.f32 %v1617_v31 }
 0x288   : > { %v4848_v32 = vpop.eup %4847 }
 0x289   : > { %v1610_v33 = vpop.xlane.xlu1 %1609  ;;  %v1629_v34 = vsel %vm1414_vm2, %v4848_v32, 0.0 }
 0x28a   : > { %v1614_v35 = vsub.f32 %v1594_v16, %v1610_v33  ;;  %1630 = vadd.xlane.f32.xlu0 %v1629_v34 }
 0x28c   : > { %v1621_v36 = vmul.f32 1.442695, %v1614_v35 }
 0x28e   : > { %4851 = vpow2.f32 %v1621_v36 }
 0x290   : > { %v4850_v38 = vpop.eup %4849 }
 0x291   : > { %v1626_v39 = vsel %vm1414_vm2, %v4850_v38, 0.0 }
 0x292   : > { %1627 = vadd.xlane.f32.xlu1 %v1626_v39 }
 0x298   : > { %v4852_v40 = vpop.eup %4851 }
 0x299   : > { %v1632_v41 = vsel %vm1414_vm2, %v4852_v40, 0.0 }
 0x29a   : > { %1633 = vadd.xlane.f32.xlu1 %v1632_v41 }
 0x30f   : > { %v1625_v42 = vpop.xlane.xlu0 %1624 }
 0x310   : > { %4853 = vrcp.f32 %v1625_v42 }
 0x317   : > { %v1631_v45 = vpop.xlane.xlu0 %1630 }
 0x318   : > { %4855 = vrcp.f32 %v1631_v45 }
 0x31a   : > { %v4854_v46 = vpop.eup %4853 }
 0x31b   : > { %v1639_v48 = vmul.f32 %v4854_v46, %v4846_v27 }
 0x31d   : > { %v1643_v50 = vpack.c.bf16 %v1639_v48, %v1639_v48 }
 0x31f   : > { %4489 = vmatmul.mubr.msk.bf16.vlgmr.msra.gmra.mrb[28].mxu0 %vm1414_vm2, %v1643_v50  ;;  %v1628_v52 = vpop.xlane.xlu1 %1627 }
 0x320   : > { %4499 = vmatpush3.bf16.msra.mxu0 %v1748_v51  ;;  %4857 = vrcp.f32 %v1628_v52  ;;  %4500 = vmatprep.mubr.msk.bf16.mxu0 %vm4950_vm0, %v4949_v1 }
 0x321   : > { %4510 = vmatprep.subr.bf16.mxu0 %v4949_v1 }
 0x322   : > { %v4856_v53 = vpop.eup %4855 }
 0x323   : > { %v1641_v37 = vmul.f32 %v4856_v53, %v4848_v32  ;;  %v4053_v53 = vld [vmem:[%s5858_s10] ss:$0 sm:$0xff] }
 0x325   : > { %v1645_v55 = vpack.c.bf16 %v1641_v37, %v1641_v37 }
 0x327   : > { %4501 = vmatmul.mubr.msk.bf16.vlgmr.msra.gmra.mrb[32].mxu0 %vm1414_vm2, %v1645_v55  ;;  %v1634_v57 = vpop.xlane.xlu1 %1633 }
 0x328   : > { %4859 = vrcp.f32 %v1634_v57  ;;  %4512 = vmatprep.mubr.msk.bf16.mxu0 %vm4950_vm0, %v4949_v1  ;;  %4511 = vmatpush3.bf16.msra.mxu0 %v1848_v4 }
 0x329   : > { %4522 = vmatprep.subr.bf16.mxu0 %v4949_v1 }
 0x32a   : > { %v4858_v59 = vpop.eup %4857 }
 0x32b   : > { %v1640_v61 = vmul.f32 %v4858_v59, %v4850_v38 }
 0x32d   : > { %v1644_v62 = vpack.c.bf16 %v1640_v61, %v1640_v61  ;;  %v4951_v61 = vmov 0  }
 0x32e   : > { %4784 = vset.pattern.permute.xlu0 %v4951_v61  ;;  %v4820_v61 = vld [vmem:[%s5889_s5 + $0x40] sm:$0xff]  }
 0x32f   : > { %4495 = vmatmul.mubr.msk.bf16.vlgmr.msra.gmra.mrb[36].mxu1 %vm1414_vm2, %v1644_v62  ;;  %v633_v62 = vld [vmem:[%s628_s24] sm:$0xff]  ;;  %s4885_s24 = scalar_lea.vmem %s5807_s20, 128 }
 0x330   : > { %4505 = vmatpush3.bf16.msra.mxu1 %v1794_v63  ;;  %4506 = vmatprep.mubr.msk.bf16.mxu1 %vm4950_vm0, %v4949_v1  ;;  %v634_v63 = vsub.f32 1.0, %v633_v62  ;;  %p4886_p11 = scmp.ne.s32.totalorder %s5807_s20, %s4885_s24  ;;  %p4893_p1 = scmp.lt.s32.totalorder %s4891_s27, %s4885_s24 }
 0x331   : > { %4516 = vmatprep.subr.bf16.mxu1 %v4949_v1 }
 0x332   : > { %v4860_v49 = vpop.eup %4859  ;;  %p4887_p12 = pnand %p4886_p11, %p5091_p5  ;;  %p4894_p2 = por %p4893_p1, %p4892_p0 }
 0x333   : > { %v1642_v0 = vmul.f32 %v4860_v49, %v4852_v40 }
 0x334   : > { %p4888_p13 = pneg %p4887_p12 }
 0x335   : > { %v1646_v2 = vpack.c.bf16 %v1642_v0, %v1642_v0 }
 0x336   : > { %p4895_p3 = pnand %p4894_p2, %p4888_p13 }
 0x337   : > { %4507 = vmatmul.mubr.msk.bf16.vlgmr.msra.gmra.mrb[40].mxu1 %vm1414_vm2, %v1646_v2 }
 0x338   : > { %4518 = vmatprep.mubr.msk.bf16.mxu1 %vm4950_vm0, %v4949_v1  ;;  %4517 = vmatpush3.bf16.msra.mxu1 %v1894_v6  ;;  %v4811_v6 = vld [vmem:[%s5863_s15] sm:$0xff]  }
 0x339   : > { %4528 = vmatprep.subr.bf16.mxu1 %v4949_v1 }
 0x3f2   : > { %v1692_v9 = vpop.f32.mrb[28].mxu0 }
 0x3f3   : > { %v1840_v10 = vpack.c.bf16 %v1692_v9, %v1692_v9  ;;  %v4490_v11 = vpop.f32.mrb[29].mxu0 }
 0x3f4   : > { %v1695_v13 = vpop.f32.mrb[30].mxu0 }
 0x3f5   : > { %v4491_v14 = vpop.f32.mrb[31].mxu0  ;;  %4513 = vmatmul.mubr.msk.bf16.vlgmr.msra.gmra.mrb[36].mxu0 %vm1414_vm2, %v1840_v10  ;;  %v4054_v13 = vld [vmem:[%s5859_s11] ss:$0 sm:$0xff] }
 0x3f6   : > { %4523 = vmatpush3.bf16.msra.mxu0 %v1940_v12  ;;  %4524 = vmatprep.mubr.msk.bf16.mxu0 %vm4950_vm0, %v4949_v1 }
 0x3f7   : > { %4534 = vmatprep.subr.bf16.mxu0 %v4949_v1 }
 0x3fa   : > { %v1784_v15 = vpop.f32.mrb[32].mxu0 }
 0x3fb   : > { %v1842_v16 = vpack.c.bf16 %v1784_v15, %v1784_v15  ;;  %v4502_v17 = vpop.f32.mrb[33].mxu0  ;;  %v4055_v15 = vld [vmem:[%s5860_s12] ss:$0 sm:$0xff] }
 0x3fc   : > { %v1787_v18 = vpop.f32.mrb[34].mxu0 }
 0x3fd   : > { %v4503_v19 = vpop.f32.mrb[35].mxu0  ;;  %4525 = vmatmul.mubr.msk.bf16.vlgmr.msra.gmra.mrb[40].mxu0 %vm1414_vm2, %v1842_v16 }
 0x3fe   : > { %4538 = vmatprep.mubr.msk.bf16.mxu0 %vm4950_vm0, %v4949_v1 }
 0x402   : > { %v1738_v21 = vpop.f32.mrb[36].mxu1 }
 0x403   : > { %v1841_v22 = vpack.c.bf16 %v1738_v21, %v1738_v21  ;;  %v4496_v23 = vpop.f32.mrb[37].mxu1  ;;  %v4813_v21 = vld [vmem:[%s5863_s15 + $0x10] sm:$0xff]  }
 0x404   : > { %v1741_v25 = vpop.f32.mrb[38].mxu1  ;;  %v4056_v23 = vld [vmem:[%s5862_s14] ss:$0 sm:$0xff] }
 0x405   : > { %v4497_v26 = vpop.f32.mrb[39].mxu1  ;;  %4519 = vmatmul.mubr.msk.bf16.vlgmr.msra.gmra.mrb[44].mxu1 %vm1414_vm2, %v1841_v22  ;;  %v4814_v22 = vld [vmem:[%s5863_s15 + $0x18] sm:$0xff]  }
 0x406   : > { %4529 = vmatpush3.bf16.msra.mxu1 %v1986_v24  ;;  %4530 = vmatprep.mubr.msk.bf16.mxu1 %vm4950_vm0, %v4949_v1 }
 0x407   : > { %4542 = vmatprep.subr.bf16.mxu1 %v4949_v1 }
 0x40a   : > { %v1830_v27 = vpop.f32.mrb[40].mxu1 }
 0x40b   : > { %v1843_v28 = vpack.c.bf16 %v1830_v27, %v1830_v27  ;;  %v4508_v29 = vpop.f32.mrb[41].mxu1 }
 0x40c   : > { %v1833_v30 = vpop.f32.mrb[42].mxu1 }
 0x40d   : > { %v4509_v31 = vpop.f32.mrb[43].mxu1  ;;  %4531 = vmatmul.mubr.msk.bf16.vlgmr.msra.gmra.mrb[48].mxu1 %vm1414_vm2, %v1843_v28 }
 0x40e   : > { %4550 = vmatprep.mubr.msk.bf16.mxu1 %vm4950_vm0, %v4949_v1  ;;  %4543 = vmatpush3.bf16.msra.mxu1 %v4811_v6  ;;  %v4060_v31 = vld [vmem:[%s5864_s16] ss:$0 sm:$0xff]  ;;  %v4829_v6 = vld [vmem:[%s5889_s5 + $0x58] sm:$0xff]  }
 0x40f   : > { %4544 = vmatprep.subr.bf16.mxu1 %v4949_v1 }
 0x412   : > { %4545 = vmatpush3.bf16.msra.mxu1 %v4812_v8  ;;  %v4830_v8 = vld [vmem:[%s5855_s7 + $0x48] sm:$0xff]  }
 0x413   : > { %4546 = vmatprep.subr.bf16.mxu1 %v4949_v1 }
 0x416   : > { %4547 = vmatpush3.bf16.msra.mxu1 %v4813_v21 }
 0x417   : > { %4548 = vmatprep.subr.bf16.mxu1 %v4949_v1 }
 0x41a   : > { %4549 = vmatpush3.bf16.msra.mxu1 %v4814_v22 }
 0x41b   : > { %4570 = vmatprep.subr.bf16.mxu1 %v4949_v1 }
 0x4c8   : > { %v1884_v32 = vpop.f32.mrb[36].mxu0 }
 0x4c9   : > { %v4514_v33 = vpop.f32.mrb[37].mxu0  ;;  %v2028_v42 = vsel %vm692_vm1, %v1884_v32, 0.0 }
 0x4ca   : > { %v1887_v34 = vpop.f32.mrb[38].mxu0 }
 0x4cb   : > { %v4515_v35 = vpop.f32.mrb[39].mxu0 }
 0x4d0   : > { %v1976_v36 = vpop.f32.mrb[40].mxu0 }
 0x4d1   : > { %v4526_v38 = vpop.f32.mrb[41].mxu0  ;;  %v2031_v47 = vsel %vm692_vm1, %v1976_v36, 0.0 }
 0x4d2   : > { %v1979_v39 = vpop.f32.mrb[42].mxu0 }
 0x4d3   : > { %v4527_v40 = vpop.f32.mrb[43].mxu0 }
 0x4d8   : > { %v1930_v41 = vpop.f32.mrb[44].mxu1 }
 0x4d9   : > { %v2029_v43 = vsel %vm692_vm1, %v1930_v41, 0.0  ;;  %v4520_v44 = vpop.f32.mrb[45].mxu1 }
 0x4da   : > { %v2030_v45 = vadd.f32 %v2029_v43, %v2028_v42  ;;  %v1933_v46 = vpop.f32.mrb[46].mxu1 }
 0x4db   : > { %v4521_v48 = vpop.f32.mrb[47].mxu1  ;;  %v4816_v46 = vld [vmem:[%s5887_s29 + $0x60] sm:$0xff]  }
 0x4dc   : > { %v2032_v50 = vadd.f32 %v2031_v47, %v2030_v45  ;;  %v4815_v45 = vld [vmem:[%s5887_s29 + $0x40] sm:$0xff]   ;;  %v4817_v47 = vld [vmem:[%s5887_s29 + $0x48] sm:$0xff]  }
 0x4dd   : > { %v4818_v48 = vld [vmem:[%s5887_s29 + $0x68] sm:$0xff]  }
 0x4e0   : > { %v2022_v51 = vpop.f32.mrb[48].mxu1 }
 0x4e1   : > { %v2033_v52 = vsel %vm692_vm1, %v2022_v51, 0.0  ;;  %v4532_v37 = vpop.f32.mrb[49].mxu1 }
 0x4e2   : > { %v2034_v54 = vadd.f32 %v2033_v52, %v2032_v50  ;;  %v2025_v55 = vpop.f32.mrb[50].mxu1  ;;  %v4066_v37 = vld [vmem:[%s5865_s17] ss:$0 sm:$0xff] }
 0x4e3   : > { %v4533_v56 = vpop.f32.mrb[51].mxu1  ;;  %v4067_v55 = vld [vmem:[%s5866_s18] ss:$0 sm:$0xff] }
 0x4e4   : > { %v2042_v57 = vadd.f32 %v4053_v53, %v2034_v54 }
 0x4e6   : > { %v2043_v59 = vadd.f32 %v2042_v57, %v5138_v7  ;;  %v4809_v7 = vld [vmem:[%s5861_s13] sm:$0xff]  }
 0x4e7   : > { %4535 = vmatpush3.bf16.msra.mxu0 %v4809_v7  ;;  %v4827_v7 = vld [vmem:[%s5889_s5 + $0x50] sm:$0xff]  }
 0x4e8   : > { %v2046_v60 = vsel %vm692_vm1, %v2043_v59, 0.0  ;;  %4536 = vmatprep.subr.bf16.mxu0 %v4949_v1 }
 0x4e9   : > { %2047 = vadd.xlane.f32.xlu0 %v2046_v60  ;;  %v4819_v60 = vld [vmem:[%s5887_s29 + $0x50] sm:$0xff]  }
 0x4eb   : > { %4537 = vmatpush3.bf16.msra.mxu0 %v4810_v5  ;;  %v4828_v5 = vld [vmem:[%s5855_s7 + $0x40] sm:$0xff]  }
 0x4ec   : > { %4554 = vmatprep.subr.bf16.mxu0 %v4949_v1 }
 0x4ff   : > { %2076 = vperm.xlu0 %4784, %v634_v63   ;;  %v4821_v63 = vld [vmem:[%s5887_s29 + $0x58] sm:$0xff]  }
 0x576   : > { %v2048_v49 = vpop.xlane.xlu0 %2047 }
 0x577   : > { %v2050_v0 = vmul.f32 0.03125, %v2048_v49  ;;  %v4822_v49 = vld [vmem:[%s5889_s5 + $0x48] sm:$0xff]  }
 0x579   : > { %v2051_v2 = vsub.f32 %v2043_v59, %v2050_v0  ;;  %v4823_v0 = vld [vmem:[%s5887_s29 + $0x70] sm:$0xff]  }
 0x57b   : > { %v2052_v3 = vmul.f32 %v2051_v2, %v2051_v2 }
 0x57d   : > { %v2053_v4 = vsel %vm692_vm1, %v2052_v3, 0.0  ;;  %v4825_v3 = vld [vmem:[%s5887_s29 + $0x78] sm:$0xff]  }
 0x57e   : > { %2054 = vadd.xlane.f32.xlu1 %v2053_v4  ;;  %v5436_v17 = vpop.permute.xlu0 %2076  ;;  %v4826_v4 = vld [vmem:[%s5889_s5 + $0x68] sm:$0xff]  }
 0x60b   : > { %v2055_v9 = vpop.xlane.xlu1 %2054 }
 0x60c   : > { %v2056_v10 = vmul.f32 0.03125, %v2055_v9  ;;  %v4831_v9 = vld [vmem:[%s5889_s5 + $0x70] sm:$0xff]  }
 0x60e   : > { %v2057_v11 = vadd.f32 1e-05, %v2056_v10  ;;  %v4832_v10 = vld [vmem:[%s5855_s7 + $0x60] sm:$0xff]  }
 0x610   : > { %4861 = vrsqrt.f32 %v2057_v11  ;;  %v4833_v11 = vld [vmem:[%s5889_s5 + $0x78] sm:$0xff]  }
 0x61a   : > { %v4862_v12 = vpop.eup %4861 }
 0x61b   : > { %v2059_v14 = vmul.f32 %v4862_v12, %v2051_v2  ;;  %v4824_v2 = vld [vmem:[%s5889_s5 + $0x60] sm:$0xff]   ;;  %v4834_v12 = vld [vmem:[%s5855_s7 + $0x68] sm:$0xff]   ;;  %s5805_s5 = scalar_lea.hbm %s5867_s19, %s4227_s22 }
 0x61d   : > { %v2066_v16 = vmul.f32 %v4054_v13, %v2059_v14  ;;  %v4835_v13 = vld [vmem:[%s5855_s7 + $0x50] sm:$0xff]   ;;  %v4836_v14 = vld [vmem:[%s5855_s7 + $0x58] sm:$0xff]  }
 0x61f   : > { %v2073_v18 = vadd.f32 %v4055_v15, %v2066_v16  ;;  %v4837_v15 = vld [vmem:[%s5855_s7 + $0x70] sm:$0xff]   ;;  %v4838_v16 = vld [vmem:[%s5855_s7 + $0x78] sm:$0xff]  }
 0x621   : > { %v2079_v19 = vmul.f32 %v5436_v17, %v2073_v18 }
 0x623   : > { %v2084_v20 = vpack.c.bf16 %v2079_v19, %v2079_v19 }
 0x625   : > { %4539 = vmatmul.mubr.msk.bf16.vlgmr.msra.gmra.mrb[44].mxu0 %vm692_vm1, %v2084_v20 }
 0x626   : > { %4558 = vmatprep.mubr.msk.bf16.mxu0 %vm4950_vm0, %v4949_v1  ;;  %4555 = vmatpush3.bf16.msra.mxu0 %v4815_v45 }
 0x627   : > { %4556 = vmatprep.subr.bf16.mxu0 %v4949_v1 }
 0x62a   : > { %4557 = vmatpush3.bf16.msra.mxu0 %v4817_v47 }
 0x62b   : > { %4562 = vmatprep.subr.bf16.mxu0 %v4949_v1 }
 0x6f8   : > { %v2141_v24 = vpop.f32.mrb[44].mxu0 }
 0x6f9   : > { %v2142_v25 = vadd.f32 %v4056_v23, %v2141_v24  ;;  %v4540_v26 = vpop.f32.mrb[45].mxu0 }
 0x6fa   : > { %v2144_v27 = vpop.f32.mrb[46].mxu0  ;;  %v4124_v26 = vld [vmem:[%s5854_s6 + $0x4] ss:$0 sm:$0xff] }
 0x6fb   : > { %v2147_v28 = vmax.f32 %v2142_v25, 0.0  ;;  %v4541_v29 = vpop.f32.mrb[47].mxu0  ;;  %v4088_v27 = vld [vmem:[%s5890_s4 + $0x4] ss:$0 sm:$0xff] }
 0x6fd   : > { %v2156_v30 = vpack.c.bf16 %v2147_v28, %v2147_v28 }
 0x6ff   : > { %4551 = vmatmul.mubr.msk.bf16.vlgmr.msra.gmra.mrb[52].mxu1 %vm2188_vm4, %v2156_v30 }
 0x700   : > { %4574 = vmatprep.mubr.msk.bf16.mxu1 %vm4950_vm0, %v4949_v1  ;;  %4571 = vmatpush3.bf16.msra.mxu1 %v4816_v46 }
 0x701   : > { %4572 = vmatprep.subr.bf16.mxu1 %v4949_v1 }
 0x704   : > { %4573 = vmatpush3.bf16.msra.mxu1 %v4818_v48 }
 0x705   : > { %4586 = vmatprep.subr.bf16.mxu1 %v4949_v1 }
 0x7d2   : > { %v2226_v32 = vpop.f32.mrb[52].mxu1 }
 0x7d3   : > { %v2227_v33 = vadd.f32 %v4060_v31, %v2226_v32  ;;  %v4552_v34 = vpop.f32.mrb[53].mxu1 }
 0x7d4   : > { %v2229_v35 = vpop.f32.mrb[54].mxu1 }
 0x7d5   : > { %v4553_v36 = vpop.f32.mrb[55].mxu1  ;;  %v2232_v38 = vadd.f32 %v2227_v33, %v2079_v19 }
 0x7d7   : > { %v2235_v39 = vsel %vm692_vm1, %v2232_v38, 0.0 }
 0x7d8   : > { %2236 = vadd.xlane.f32.xlu1 %v2235_v39 }
 0x865   : > { %v2237_v40 = vpop.xlane.xlu1 %2236 }
 0x866   : > { %v2238_v41 = vmul.f32 0.03125, %v2237_v40 }
 0x868   : > { %v2239_v42 = vsub.f32 %v2232_v38, %v2238_v41  ;;  %v4126_v41 = vld [vmem:[%s5854_s6 + $0x6] ss:$0 sm:$0xff] }
 0x86a   : > { %v2240_v43 = vmul.f32 %v2239_v42, %v2239_v42 }
 0x86c   : > { %v2241_v44 = vsel %vm692_vm1, %v2240_v43, 0.0  ;;  %v4090_v43 = vld [vmem:[%s5890_s4 + $0x6] ss:$0 sm:$0xff] }
 0x86d   : > { %2242 = vadd.xlane.f32.xlu1 %v2241_v44 }
 0x8fa   : > { %v2243_v50 = vpop.xlane.xlu1 %2242 }
 0x8fb   : > { %v2244_v51 = vmul.f32 0.03125, %v2243_v50 }
 0x8fd   : > { %v2245_v52 = vadd.f32 1e-05, %v2244_v51 }
 0x8ff   : > { %4863 = vrsqrt.f32 %v2245_v52 }
 0x909   : > { %v4864_v53 = vpop.eup %4863 }
 0x90a   : > { %v2247_v54 = vmul.f32 %v4864_v53, %v2239_v42 }
 0x90c   : > { %v2254_v56 = vmul.f32 %v4066_v37, %v2247_v54 }
 0x90e   : > { %v2261_v57 = vadd.f32 %v4067_v55, %v2254_v56 }
 0x910   : > { %v5484_v59 = vmul.f32 %v2261_v57, %v5436_v17  ;;  %v4125_v57 = vld [vmem:[%s5854_s6 + $0x5] ss:$0 sm:$0xff] }
 0x912   : > { %v5494_v62 = vpack.c.bf16 %v5484_v59, %v5484_v59 }
 0x914   : > { %4559 = vmatmul.mubr.msk.bf16.vlgmr.msra.gmra.mrb[48].mxu0 %vm692_vm1, %v5494_v62  ;;  %4575 = vmatmul.mubr.msk.bf16.vlgmr.msra.gmra.mrb[56].mxu1 %vm692_vm1, %v5494_v62 }
 0x915   : > { %4563 = vmatpush3.bf16.msra.mxu0 %v4819_v60  ;;  %4587 = vmatpush3.bf16.msra.mxu1 %v4820_v61  ;;  %v4160_v60 = vld [vmem:[%s5856_s8 + $0x4] ss:$0 sm:$0xff] }
 0x916   : > { %4564 = vmatprep.subr.bf16.mxu0 %v4949_v1  ;;  %4588 = vmatprep.subr.bf16.mxu1 %v4949_v1 }
 0x917   : > { %4566 = vmatprep.mubr.msk.bf16.mxu0 %vm4950_vm0, %v4949_v1  ;;  %4590 = vmatprep.mubr.msk.bf16.mxu1 %vm4950_vm0, %v4949_v1 }
 0x919   : > { %4565 = vmatpush3.bf16.msra.mxu0 %v4821_v63  ;;  %4589 = vmatpush3.bf16.msra.mxu1 %v4822_v49 }
 0x91a   : > { %4578 = vmatprep.subr.bf16.mxu0 %v4949_v1  ;;  %4602 = vmatprep.subr.bf16.mxu1 %v4949_v1 }
 0x91c   : > { %4567 = vmatmul.mubr.msk.bf16.vlgmr.msra.gmra.mrb[52].mxu0 %vm692_vm1, %v5494_v62  ;;  %4591 = vmatmul.mubr.msk.bf16.vlgmr.msra.gmra.mrb[60].mxu1 %vm692_vm1, %v5494_v62 }
 0x91d   : > { %4579 = vmatpush3.bf16.msra.mxu0 %v4823_v0  ;;  %4603 = vmatpush3.bf16.msra.mxu1 %v4824_v2 }
 0x91e   : > { %4580 = vmatprep.subr.bf16.mxu0 %v4949_v1  ;;  %4604 = vmatprep.subr.bf16.mxu1 %v4949_v1 }
 0x91f   : > { %4582 = vmatprep.mubr.msk.bf16.mxu0 %vm4950_vm0, %v4949_v1  ;;  %4606 = vmatprep.mubr.msk.bf16.mxu1 %vm4950_vm0, %v4949_v1 }
 0x921   : > { %4581 = vmatpush3.bf16.msra.mxu0 %v4825_v3  ;;  %4605 = vmatpush3.bf16.msra.mxu1 %v4826_v4 }
 0x922   : > { %4594 = vmatprep.subr.bf16.mxu0 %v4949_v1  ;;  %4618 = vmatprep.subr.bf16.mxu1 %v4949_v1 }
 0x924   : > { %4583 = vmatmul.mubr.msk.bf16.vlgmr.msra.gmra.mrb[56].mxu0 %vm692_vm1, %v5494_v62  ;;  %4607 = vmatmul.mubr.msk.bf16.vlgmr.msra.gmra.mrb[64].mxu1 %vm692_vm1, %v5494_v62 }
 0x925   : > { %4595 = vmatpush3.bf16.msra.mxu0 %v4827_v7  ;;  %4619 = vmatpush3.bf16.msra.mxu1 %v4828_v5 }
 0x926   : > { %4596 = vmatprep.subr.bf16.mxu0 %v4949_v1  ;;  %4620 = vmatprep.subr.bf16.mxu1 %v4949_v1 }
 0x927   : > { %4598 = vmatprep.mubr.msk.bf16.mxu0 %vm4950_vm0, %v4949_v1  ;;  %4622 = vmatprep.mubr.msk.bf16.mxu1 %vm4950_vm0, %v4949_v1 }
 0x929   : > { %4597 = vmatpush3.bf16.msra.mxu0 %v4829_v6  ;;  %4621 = vmatpush3.bf16.msra.mxu1 %v4830_v8 }
 0x92a   : > { %4610 = vmatprep.subr.bf16.mxu0 %v4949_v1  ;;  %4634 = vmatprep.subr.bf16.mxu1 %v4949_v1 }
 0x92c   : > { %4599 = vmatmul.mubr.msk.bf16.vlgmr.msra.gmra.mrb[60].mxu0 %vm692_vm1, %v5494_v62  ;;  %4623 = vmatmul.mubr.msk.bf16.vlgmr.msra.gmra.mrb[68].mxu1 %vm692_vm1, %v5494_v62 }
 0x92d   : > { %4611 = vmatpush3.bf16.msra.mxu0 %v4831_v9  ;;  %4635 = vmatpush3.bf16.msra.mxu1 %v4832_v10 }
 0x92e   : > { %4612 = vmatprep.subr.bf16.mxu0 %v4949_v1  ;;  %4636 = vmatprep.subr.bf16.mxu1 %v4949_v1 }
 0x92f   : > { %4614 = vmatprep.mubr.msk.bf16.mxu0 %vm4950_vm0, %v4949_v1  ;;  %4638 = vmatprep.mubr.msk.bf16.mxu1 %vm4950_vm0, %v4949_v1 }
 0x931   : > { %4613 = vmatpush3.bf16.msra.mxu0 %v4833_v11  ;;  %4637 = vmatpush3.bf16.msra.mxu1 %v4834_v12 }
 0x932   : > { %4626 = vmatprep.subr.bf16.mxu0 %v4949_v1  ;;  %4650 = vmatprep.subr.bf16.mxu1 %v4949_v1 }
 0x934   : > { %4615 = vmatmul.mubr.msk.bf16.vlgmr.msra.gmra.mrb[64].mxu0 %vm692_vm1, %v5494_v62  ;;  %4639 = vmatmul.mubr.msk.bf16.vlgmr.msra.gmra.mrb[72].mxu1 %vm692_vm1, %v5494_v62 }
 0x935   : > { %4627 = vmatpush3.bf16.msra.mxu0 %v4835_v13  ;;  %4630 = vmatprep.mubr.msk.bf16.mxu0 %vm4950_vm0, %v4949_v1 }
 0x936   : > { %4628 = vmatprep.subr.bf16.mxu0 %v4949_v1  ;;  %4652 = vmatprep.mubr.msk.bf16.mxu1 %vm4950_vm0, %v4949_v1 }
 0x939   : > { %4629 = vmatpush3.bf16.msra.mxu0 %v4836_v14 }
 0x93a   : > { %4642 = vmatprep.subr.bf16.mxu0 %v4949_v1 }
 0x93c   : > { %4631 = vmatmul.mubr.msk.bf16.vlgmr.msra.gmra.mrb[68].mxu0 %vm692_vm1, %v5494_v62 }
 0x93d   : > { %4643 = vmatpush3.bf16.msra.mxu0 %v4837_v15  ;;  %4646 = vmatprep.mubr.msk.bf16.mxu0 %vm4950_vm0, %v4949_v1  ;;  %v4127_v15 = vld [vmem:[%s5854_s6 + $0x7] ss:$0 sm:$0xff] }
 0x93e   : > { %4644 = vmatprep.subr.bf16.mxu0 %v4949_v1 }
 0x941   : > { %4645 = vmatpush3.bf16.msra.mxu0 %v4838_v16 }
 0x942   : > { %4656 = vmatprep.subr.bf16.mxu0 %v4949_v1 }
 0x944   : > { %4647 = vmatmul.mubr.msk.bf16.vlgmr.msra.gmra.mrb[72].mxu0 %vm692_vm1, %v5494_v62  ;;  %v4089_v62 = vld [vmem:[%s5890_s4 + $0x5] ss:$0 sm:$0xff] }
 0x945   : > { %4658 = vmatprep.mubr.msk.bf16.mxu0 %vm4950_vm0, %v4949_v1 }
 0x9e7   : > { %v2359_v18 = vpop.f32.mrb[48].mxu0  ;;  %v2463_v19 = vpop.f32.mrb[56].mxu1 }
 0x9e8   : > { %v4560_v20 = vpop.f32.mrb[49].mxu0  ;;  %v4576_v21 = vpop.f32.mrb[57].mxu1  ;;  %v2360_v35 = vadd.f32 %v4088_v27, %v2359_v18  ;;  %v2464_v53 = vadd.f32 %v4090_v43, %v2463_v19  ;;  %v4091_v18 = vld [vmem:[%s5890_s4 + $0x7] ss:$0 sm:$0xff] }
 0x9e9   : > { %v2362_v22 = vpop.f32.mrb[50].mxu0  ;;  %v2466_v23 = vpop.f32.mrb[58].mxu1 }
 0x9ea   : > { %v4561_v24 = vpop.f32.mrb[51].mxu0  ;;  %v4577_v25 = vpop.f32.mrb[59].mxu1  ;;  %v2521_v42 = vmul.f32 0.35355338, %v2360_v35  ;;  %v2523_v61 = vmul.f32 0.35355338, %v2464_v53 }
 0x9ec   : > { %v3033_v52 = vpack.c.bf16 %v2521_v42, %v2521_v42  ;;  %v3035_v6 = vpack.c.bf16 %v2523_v61, %v2523_v61 }
 0x9ef   : > { %v2411_v28 = vpop.f32.mrb[52].mxu0  ;;  %v2617_v29 = vpop.f32.mrb[60].mxu1 }
 0x9f0   : > { %v2618_v30 = vadd.f32 %v4124_v26, %v2617_v29  ;;  %v4568_v31 = vpop.f32.mrb[53].mxu0  ;;  %v4592_v32 = vpop.f32.mrb[61].mxu1  ;;  %v2412_v8 = vadd.f32 %v4089_v62, %v2411_v28 }
 0x9f1   : > { %v2414_v33 = vpop.f32.mrb[54].mxu0  ;;  %v2620_v34 = vpop.f32.mrb[62].mxu1  ;;  %v4161_v32 = vld [vmem:[%s5856_s8 + $0x5] ss:$0 sm:$0xff] }
 0x9f2   : > { %v3037_v36 = vpack.c.bf16 %v2618_v30, %v2618_v30  ;;  %v4569_v38 = vpop.f32.mrb[55].mxu0  ;;  %v4593_v39 = vpop.f32.mrb[63].mxu1  ;;  %v2522_v16 = vmul.f32 0.35355338, %v2412_v8 }
 0x9f4   : > { %v3045_v40 = vsel %vm1414_vm2, %v3037_v36, 0  ;;  %v3034_v26 = vpack.c.bf16 %v2522_v16, %v2522_v16 }
 0x9f5   : > { %4651 = vmatpush3.bf16.xpose.msra.mxu1 %v3045_v40 }
 0x9f6   : > { %4662 = vmatprep.subr.bf16.mxu1 %v4949_v1 }
 0x9f7   : > { %v2515_v44 = vpop.f32.mrb[56].mxu0  ;;  %v2721_v45 = vpop.f32.mrb[64].mxu1 }
 0x9f8   : > { %v2722_v46 = vadd.f32 %v4126_v41, %v2721_v45  ;;  %v4584_v47 = vpop.f32.mrb[57].mxu0  ;;  %v4608_v48 = vpop.f32.mrb[65].mxu1  ;;  %v2516_v27 = vadd.f32 %v4091_v18, %v2515_v44 }
 0x9f9   : > { %v2518_v50 = vpop.f32.mrb[58].mxu0  ;;  %v2724_v51 = vpop.f32.mrb[66].mxu1 }
 0x9fa   : > { %v3039_v37 = vpack.c.bf16 %v2722_v46, %v2722_v46  ;;  %v4585_v54 = vpop.f32.mrb[59].mxu0  ;;  %v4609_v55 = vpop.f32.mrb[67].mxu1  ;;  %v2524_v33 = vmul.f32 0.35355338, %v2516_v27 }
 0x9fc   : > { %v3137_v56 = vsel %vm1414_vm2, %v3039_v37, 0  ;;  %4653 = vmatmul.mubr.msk.bf16.vlgmr.msra.gmra.mrb[76].mxu1 %vm1414_vm2, %v3033_v52  ;;  %v3036_v39 = vpack.c.bf16 %v2524_v33, %v2524_v33 }
 0x9fd   : > { %4663 = vmatpush3.bf16.xpose.msra.mxu1 %v3137_v56  ;;  %4664 = vmatprep.mubr.msk.bf16.mxu1 %vm4950_vm0, %v4949_v1 }
 0x9fe   : > { %4674 = vmatprep.subr.bf16.mxu1 %v4949_v1 }
 0x9ff   : > { %v2669_v63 = vpop.f32.mrb[60].mxu0  ;;  %v2871_v49 = vpop.f32.mrb[68].mxu1 }
 0xa00   : > { %v2670_v0 = vadd.f32 %v4125_v57, %v2669_v63  ;;  %v2872_v2 = vadd.f32 %v4160_v60, %v2871_v49  ;;  %v4600_v3 = vpop.f32.mrb[61].mxu0  ;;  %v4624_v4 = vpop.f32.mrb[69].mxu1 }
 0xa01   : > { %v2672_v7 = vpop.f32.mrb[62].mxu0  ;;  %v2874_v5 = vpop.f32.mrb[70].mxu1 }
 0xa02   : > { %v3038_v9 = vpack.c.bf16 %v2670_v0, %v2670_v0  ;;  %v3273_v10 = vpack.c.bf16 %v2872_v2, %v2872_v2  ;;  %v4601_v11 = vpop.f32.mrb[63].mxu0  ;;  %v4625_v12 = vpop.f32.mrb[71].mxu1 }
 0xa04   : > { %v3091_v13 = vsel %vm1414_vm2, %v3038_v9, 0  ;;  %v3281_v14 = vsel %vm1654_vm3, %v3273_v10, 0  ;;  %4665 = vmatmul.mubr.msk.bf16.vlgmr.msra.gmra.mrb[80].mxu1 %vm1414_vm2, %v3035_v6 }
 0xa05   : > { %4657 = vmatpush3.bf16.xpose.msra.mxu0 %v3091_v13  ;;  %4675 = vmatpush3.bf16.msra.mxu1 %v3281_v14 }
 0xa06   : > { %4668 = vmatprep.subr.bf16.mxu0 %v4949_v1  ;;  %4676 = vmatprep.mubr.msk.bf16.mxu1 %vm4950_vm0, %v4949_v1 }
 0xa07   : > { %v2773_v19 = vpop.f32.mrb[64].mxu0  ;;  %v5658_v20 = vpop.f32.mrb[72].mxu1  ;;  %4686 = vmatprep.subr.bf16.mxu1 %v4949_v1 }
 0xa08   : > { %v2774_v21 = vadd.f32 %v4127_v15, %v2773_v19  ;;  %v4616_v22 = vpop.f32.mrb[65].mxu0  ;;  %v4640_v23 = vpop.f32.mrb[73].mxu1 }
 0xa09   : > { %v2776_v24 = vpop.f32.mrb[66].mxu0  ;;  %v2978_v25 = vpop.f32.mrb[74].mxu1 }
 0xa0a   : > { %v3040_v28 = vpack.c.bf16 %v2774_v21, %v2774_v21  ;;  %v4617_v29 = vpop.f32.mrb[67].mxu0  ;;  %v4641_v30 = vpop.f32.mrb[75].mxu1 }
 0xa0c   : > { %v3183_v31 = vsel %vm1414_vm2, %v3040_v28, 0  ;;  %4659 = vmatmul.mubr.msk.bf16.vlgmr.msra.gmra.mrb[76].mxu0 %vm1414_vm2, %v3034_v26 }
 0xa0d   : > { %4669 = vmatpush3.bf16.xpose.msra.mxu0 %v3183_v31  ;;  %4670 = vmatprep.mubr.msk.bf16.mxu0 %vm4950_vm0, %v4949_v1  ;;  %v4162_v31 = vld [vmem:[%s5856_s8 + $0x6] ss:$0 sm:$0xff] }
 0xa0e   : > { %4680 = vmatprep.subr.bf16.mxu0 %v4949_v1 }
 0xa0f   : > { %v2923_v34 = vpop.f32.mrb[68].mxu0 }
 0xa10   : > { %v2924_v35 = vadd.f32 %v4161_v32, %v2923_v34  ;;  %v4632_v36 = vpop.f32.mrb[69].mxu0  ;;  %v2976_v32 = vadd.f32 %v4162_v31, %v5658_v20  ;;  %v4163_v20 = vld [vmem:[%s5856_s8 + $0x7] ss:$0 sm:$0xff] }
 0xa11   : > { %v2926_v38 = vpop.f32.mrb[70].mxu0 }
 0xa12   : > { %v3274_v40 = vpack.c.bf16 %v2924_v35, %v2924_v35  ;;  %v4633_v41 = vpop.f32.mrb[71].mxu0  ;;  %v3275_v34 = vpack.c.bf16 %v2976_v32, %v2976_v32 }
 0xa14   : > { %v3327_v42 = vsel %vm1654_vm3, %v3274_v40, 0  ;;  %4671 = vmatmul.mubr.msk.bf16.vlgmr.msra.gmra.mrb[80].mxu0 %vm1414_vm2, %v3036_v39  ;;  %v3373_v38 = vsel %vm1654_vm3, %v3275_v34, 0 }
 0xa15   : > { %4681 = vmatpush3.bf16.msra.mxu0 %v3327_v42  ;;  %4682 = vmatprep.mubr.msk.bf16.mxu0 %vm4950_vm0, %v4949_v1 }
 0xa16   : > { %4692 = vmatprep.subr.bf16.mxu0 %v4949_v1 }
 0xa17   : > { %v5674_v43 = vpop.f32.mrb[72].mxu0 }
 0xa18   : > { %v4648_v44 = vpop.f32.mrb[73].mxu0  ;;  %v3028_v41 = vadd.f32 %v4163_v20, %v5674_v43  ;;  %v4193_v20 = vld [vmem:[%s5858_s10 + $0x1] ss:$0 sm:$0xff] }
 0xa19   : > { %v3030_v45 = vpop.f32.mrb[74].mxu0 }
 0xa1a   : > { %v4649_v46 = vpop.f32.mrb[75].mxu0  ;;  %v3276_v45 = vpack.c.bf16 %v3028_v41, %v3028_v41 }
 0xacf   : > { %v3081_v47 = vpop.f32.mrb[76].mxu1 }
 0xad0   : > { %v3082_v48 = vadd.f32 %v3081_v47, %v5329_v58  ;;  %v4654_v50 = vpop.f32.mrb[77].mxu1 }
 0xad1   : > { %v3084_v51 = vpop.f32.mrb[78].mxu1  ;;  %v3419_v50 = vsel %vm1654_vm3, %v3276_v45, 0 }
 0xad2   : > { %v4655_v52 = vpop.f32.mrb[79].mxu1  ;;  %v3225_v53 = vsel %vm1414_vm2, %v3082_v48, -inf }
 0xad3   : > { %3226 = vmax.xlane.f32.xlu1 %v3225_v53 }
 0xad7   : > { %v3173_v37 = vpop.f32.mrb[80].mxu1 }
 0xad8   : > { %v4666_v54 = vpop.f32.mrb[81].mxu1  ;;  %v3174_v63 = vadd.f32 %v3173_v37, %v5329_v58 }
 0xad9   : > { %v3176_v55 = vpop.f32.mrb[82].mxu1  ;;  %v4184_v54 = vld [vmem:[%s5857_s9 + $0x10] sm:$0xf] }
 0xada   : > { %v4667_v56 = vpop.f32.mrb[83].mxu1  ;;  %v3231_v2 = vsel %vm1414_vm2, %v3174_v63, -inf  ;;  %v3474_v55 = vsel %vm1654_vm3, %v4184_v54, 0  ;;  %v4840_v54 = vld [vmem:[%s5861_s13 + $0x18] sm:$0xff]  }
 0xadb   : > { %v4185_v56 = vld [vmem:[%s5857_s9 + $0x14] sm:$0xf] }
 0xadf   : > { %v3127_v57 = vpop.f32.mrb[76].mxu0 }
 0xae0   : > { %v3128_v60 = vadd.f32 %v3127_v57, %v5329_v58  ;;  %v4660_v61 = vpop.f32.mrb[77].mxu0  ;;  %v3520_v57 = vsel %vm1654_vm3, %v4185_v56, 0 }
 0xae1   : > { %v3130_v62 = vpop.f32.mrb[78].mxu0 }
 0xae2   : > { %v4661_v49 = vpop.f32.mrb[79].mxu0  ;;  %v3228_v0 = vsel %vm1414_vm2, %v3128_v60, -inf }
 0xae3   : > { %3229 = vmax.xlane.f32.xlu1 %v3228_v0 }
 0xae7   : > { %v3219_v3 = vpop.f32.mrb[80].mxu0  ;;  %3232 = vmax.xlane.f32.xlu1 %v3231_v2 }
 0xae8   : > { %v3220_v4 = vadd.f32 %v3219_v3, %v5329_v58  ;;  %v4672_v7 = vpop.f32.mrb[81].mxu0  ;;  %v4187_v3 = vld [vmem:[%s5857_s9 + $0x1c] sm:$0xf] }
 0xae9   : > { %v3222_v5 = vpop.f32.mrb[82].mxu0 }
 0xaea   : > { %v4673_v6 = vpop.f32.mrb[83].mxu0  ;;  %v3234_v8 = vsel %vm1414_vm2, %v3220_v4, -inf }
 0xaeb   : > { %3235 = vmax.xlane.f32.xlu1 %v3234_v8  ;;  %v3612_v6 = vsel %vm1654_vm3, %v4187_v3, 0 }
 0xb60   : > { %v3227_v9 = vpop.xlane.xlu1 %3226 }
 0xb61   : > { %v3237_v10 = vsub.f32 %v3082_v48, %v3227_v9 }
 0xb63   : > { %v3241_v11 = vmul.f32 1.442695, %v3237_v10 }
 0xb65   : > { %4865 = vpow2.f32 %v3241_v11 }
 0xb6f   : > { %v4866_v12 = vpop.eup %4865 }
 0xb70   : > { %v3230_v13 = vpop.xlane.xlu1 %3229  ;;  %v3249_v14 = vsel %vm1414_vm2, %v4866_v12, 0.0 }
 0xb71   : > { %v3238_v15 = vsub.f32 %v3128_v60, %v3230_v13  ;;  %3250 = vadd.xlane.f32.xlu1 %v3249_v14  ;;  %v4186_v60 = vld [vmem:[%s5857_s9 + $0x18] sm:$0xf] }
 0xb72   : > { %v3566_v49 = vsel %vm1654_vm3, %v4186_v60, 0 }
 0xb73   : > { %v3243_v16 = vmul.f32 1.442695, %v3238_v15 }
 0xb74   : > { %v3233_v18 = vpop.xlane.xlu1 %3232 }
 0xb75   : > { %4867 = vpow2.f32 %v3243_v16  ;;  %v3239_v58 = vsub.f32 %v3174_v63, %v3233_v18 }
 0xb77   : > { %v3245_v19 = vmul.f32 1.442695, %v3239_v58 }
 0xb78   : > { %v3236_v21 = vpop.xlane.xlu1 %3235 }
 0xb79   : > { %4869 = vpow2.f32 %v3245_v19  ;;  %v3240_v22 = vsub.f32 %v3220_v4, %v3236_v21 }
 0xb7b   : > { %v3247_v23 = vmul.f32 1.442695, %v3240_v22 }
 0xb7d   : > { %4871 = vpow2.f32 %v3247_v23 }
 0xb7f   : > { %v4868_v24 = vpop.eup %4867 }
 0xb80   : > { %v3252_v25 = vsel %vm1414_vm2, %v4868_v24, 0.0 }
 0xb81   : > { %3253 = vadd.xlane.f32.xlu1 %v3252_v25 }
 0xb83   : > { %v4870_v26 = vpop.eup %4869 }
 0xb84   : > { %v3255_v27 = vsel %vm1414_vm2, %v4870_v26, 0.0 }
 0xb85   : > { %3256 = vadd.xlane.f32.xlu1 %v3255_v27 }
 0xb87   : > { %v4872_v28 = vpop.eup %4871 }
 0xb88   : > { %v3258_v29 = vsel %vm1414_vm2, %v4872_v28, 0.0 }
 0xb89   : > { %3259 = vadd.xlane.f32.xlu1 %v3258_v29 }
 0xbfe   : > { %v3251_v30 = vpop.xlane.xlu1 %3250 }
 0xbff   : > { %4873 = vrcp.f32 %v3251_v30 }
 0xc09   : > { %v4874_v33 = vpop.eup %4873 }
 0xc0a   : > { %v3265_v35 = vmul.f32 %v4874_v33, %v4866_v12 }
 0xc0c   : > { %v3269_v36 = vpack.c.bf16 %v3265_v35, %v3265_v35 }
 0xc0e   : > { %4677 = vmatmul.mubr.msk.bf16.vlgmr.msra.gmra.mrb[84].mxu1 %vm1414_vm2, %v3269_v36  ;;  %v3254_v39 = vpop.xlane.xlu1 %3253 }
 0xc0f   : > { %4687 = vmatpush3.bf16.msra.mxu1 %v3373_v38  ;;  %4875 = vrcp.f32 %v3254_v39  ;;  %4688 = vmatprep.mubr.msk.bf16.mxu1 %vm4950_vm0, %v4949_v1 }
 0xc10   : > { %4698 = vmatprep.subr.bf16.mxu1 %v4949_v1 }
 0xc12   : > { %v3257_v40 = vpop.xlane.xlu1 %3256 }
 0xc13   : > { %4877 = vrcp.f32 %v3257_v40 }
 0xc16   : > { %v3260_v42 = vpop.xlane.xlu1 %3259 }
 0xc17   : > { %4879 = vrcp.f32 %v3260_v42 }
 0xc19   : > { %v4876_v44 = vpop.eup %4875 }
 0xc1a   : > { %v3266_v46 = vmul.f32 %v4876_v44, %v4868_v24 }
 0xc1c   : > { %v3270_v47 = vpack.c.bf16 %v3266_v46, %v3266_v46 }
 0xc1d   : > { %v4878_v48 = vpop.eup %4877 }
 0xc1e   : > { %v3267_v51 = vmul.f32 %v4878_v48, %v4870_v26  ;;  %4683 = vmatmul.mubr.msk.bf16.vlgmr.msra.gmra.mrb[84].mxu0 %vm1414_vm2, %v3270_v47 }
 0xc1f   : > { %4693 = vmatpush3.bf16.msra.mxu0 %v3419_v50  ;;  %4694 = vmatprep.mubr.msk.bf16.mxu0 %vm4950_vm0, %v4949_v1 }
 0xc20   : > { %v3271_v52 = vpack.c.bf16 %v3267_v51, %v3267_v51  ;;  %4704 = vmatprep.subr.bf16.mxu0 %v4949_v1 }
 0xc21   : > { %v4880_v43 = vpop.eup %4879 }
 0xc22   : > { %v3268_v53 = vmul.f32 %v4880_v43, %v4872_v28  ;;  %4689 = vmatmul.mubr.msk.bf16.vlgmr.msra.gmra.mrb[88].mxu1 %vm1414_vm2, %v3271_v52 }
 0xc23   : > { %4700 = vmatprep.mubr.msk.bf16.mxu1 %vm4950_vm0, %v4949_v1  ;;  %4699 = vmatpush3.bf16.msra.mxu1 %v3474_v55  ;;  %v4842_v55 = vld [vmem:[%s5863_s15 + $0x28] sm:$0xff]  }
 0xc24   : > { %v3272_v37 = vpack.c.bf16 %v3268_v53, %v3268_v53  ;;  %4710 = vmatprep.subr.bf16.mxu1 %v4949_v1 }
 0xc26   : > { %4695 = vmatmul.mubr.msk.bf16.vlgmr.msra.gmra.mrb[88].mxu0 %vm1414_vm2, %v3272_v37  ;;  %v4839_v37 = vld [vmem:[%s5861_s13 + $0x10] sm:$0xff]  }
 0xc27   : > { %4706 = vmatprep.mubr.msk.bf16.mxu0 %vm4950_vm0, %v4949_v1  ;;  %4705 = vmatpush3.bf16.msra.mxu0 %v3520_v57 }
 0xc28   : > { %4716 = vmatprep.subr.bf16.mxu0 %v4949_v1 }
 0xce1   : > { %v3317_v61 = vpop.f32.mrb[84].mxu1 }
 0xce2   : > { %v3466_v62 = vpack.c.bf16 %v3317_v61, %v3317_v61  ;;  %v4678_v63 = vpop.f32.mrb[85].mxu1 }
 0xce3   : > { %v3320_v0 = vpop.f32.mrb[86].mxu1 }
 0xce4   : > { %v4679_v2 = vpop.f32.mrb[87].mxu1  ;;  %4701 = vmatmul.mubr.msk.bf16.vlgmr.msra.gmra.mrb[92].mxu1 %vm1414_vm2, %v3466_v62  ;;  %v4196_v62 = vld [vmem:[%s5859_s11 + $0x1] ss:$0 sm:$0xff] }
 0xce5   : > { %4711 = vmatpush3.bf16.msra.mxu1 %v3566_v49  ;;  %4712 = vmatprep.mubr.msk.bf16.mxu1 %vm4950_vm0, %v4949_v1  ;;  %v4197_v49 = vld [vmem:[%s5860_s12 + $0x1] ss:$0 sm:$0xff] }
 0xce6   : > { %4722 = vmatprep.subr.bf16.mxu1 %v4949_v1 }
 0xcf1   : > { %v3363_v4 = vpop.f32.mrb[84].mxu0 }
 0xcf2   : > { %v3467_v7 = vpack.c.bf16 %v3363_v4, %v3363_v4  ;;  %v4684_v5 = vpop.f32.mrb[85].mxu0 }
 0xcf3   : > { %v3366_v8 = vpop.f32.mrb[86].mxu0  ;;  %v4844_v5 = vld [vmem:[%s5863_s15 + $0x38] sm:$0xff]  }
 0xcf4   : > { %v4685_v9 = vpop.f32.mrb[87].mxu0  ;;  %4707 = vmatmul.mubr.msk.bf16.vlgmr.msra.gmra.mrb[92].mxu0 %vm1414_vm2, %v3467_v7  ;;  %v4843_v7 = vld [vmem:[%s5863_s15 + $0x30] sm:$0xff]  }
 0xcf5   : > { %v3409_v10 = vpop.f32.mrb[88].mxu1  ;;  %4717 = vmatpush3.bf16.msra.mxu0 %v3612_v6  ;;  %4718 = vmatprep.mubr.msk.bf16.mxu0 %vm4950_vm0, %v4949_v1  ;;  %v4203_v6 = vld [vmem:[%s5862_s14 + $0x1] ss:$0 sm:$0xff] }
 0xcf6   : > { %v3468_v11 = vpack.c.bf16 %v3409_v10, %v3409_v10  ;;  %v4690_v12 = vpop.f32.mrb[89].mxu1  ;;  %4730 = vmatprep.subr.bf16.mxu0 %v4949_v1 }
 0xcf7   : > { %v3412_v13 = vpop.f32.mrb[90].mxu1 }
 0xcf8   : > { %v4691_v14 = vpop.f32.mrb[91].mxu1  ;;  %4713 = vmatmul.mubr.msk.bf16.vlgmr.msra.gmra.mrb[96].mxu1 %vm1414_vm2, %v3468_v11 }
 0xcf9   : > { %v3455_v15 = vpop.f32.mrb[88].mxu0  ;;  %4726 = vmatprep.mubr.msk.bf16.mxu1 %vm4950_vm0, %v4949_v1  ;;  %4723 = vmatpush3.bf16.msra.mxu1 %v4839_v37 }
 0xcfa   : > { %v3469_v16 = vpack.c.bf16 %v3455_v15, %v3455_v15  ;;  %v4696_v18 = vpop.f32.mrb[89].mxu0  ;;  %4724 = vmatprep.subr.bf16.mxu1 %v4949_v1 }
 0xcfb   : > { %v3458_v58 = vpop.f32.mrb[90].mxu0 }
 0xcfc   : > { %v4697_v19 = vpop.f32.mrb[91].mxu0  ;;  %4719 = vmatmul.mubr.msk.bf16.vlgmr.msra.gmra.mrb[96].mxu0 %vm1414_vm2, %v3469_v16 }
 0xcfd   : > { %4738 = vmatprep.mubr.msk.bf16.mxu0 %vm4950_vm0, %v4949_v1  ;;  %4725 = vmatpush3.bf16.msra.mxu1 %v4840_v54 }
 0xdb7   : > { %v3510_v21 = vpop.f32.mrb[92].mxu1 }
 0xdb8   : > { %v4702_v22 = vpop.f32.mrb[93].mxu1  ;;  %v3654_v26 = vsel %vm692_vm1, %v3510_v21, 0.0 }
 0xdb9   : > { %v3513_v23 = vpop.f32.mrb[94].mxu1 }
 0xdba   : > { %v4703_v24 = vpop.f32.mrb[95].mxu1 }
 0xdc7   : > { %v3556_v25 = vpop.f32.mrb[92].mxu0 }
 0xdc8   : > { %v3655_v27 = vsel %vm692_vm1, %v3556_v25, 0.0  ;;  %v4708_v28 = vpop.f32.mrb[93].mxu0 }
 0xdc9   : > { %v3656_v29 = vadd.f32 %v3655_v27, %v3654_v26  ;;  %v3559_v30 = vpop.f32.mrb[94].mxu0 }
 0xdca   : > { %v4709_v31 = vpop.f32.mrb[95].mxu0 }
 0xdcb   : > { %v3602_v32 = vpop.f32.mrb[96].mxu1 }
 0xdcc   : > { %v3657_v33 = vsel %vm692_vm1, %v3602_v32, 0.0  ;;  %v4714_v34 = vpop.f32.mrb[97].mxu1  ;;  %v4224_v32 = vld [vmem:[%s5865_s17 + $0x1] ss:$0 sm:$0xff] }
 0xdcd   : > { %v3658_v35 = vadd.f32 %v3657_v33, %v3656_v29  ;;  %v3605_v36 = vpop.f32.mrb[98].mxu1  ;;  %v4225_v34 = vld [vmem:[%s5866_s18 + $0x1] ss:$0 sm:$0xff] }
 0xdce   : > { %v4715_v38 = vpop.f32.mrb[99].mxu1 }
 0xdcf   : > { %v3648_v39 = vpop.f32.mrb[96].mxu0 }
 0xdd0   : > { %v3659_v40 = vsel %vm692_vm1, %v3648_v39, 0.0  ;;  %v4720_v41 = vpop.f32.mrb[97].mxu0 }
 0xdd1   : > { %v3660_v42 = vadd.f32 %v3659_v40, %v3658_v35  ;;  %v3651_v44 = vpop.f32.mrb[98].mxu0 }
 0xdd2   : > { %v4721_v45 = vpop.f32.mrb[99].mxu0 }
 0xdd3   : > { %v3669_v46 = vadd.f32 %v4193_v20, %v3660_v42 }
 0xdd5   : > { %v3670_v47 = vadd.f32 %v3669_v46, %v5484_v59  ;;  %v4841_v59 = vld [vmem:[%s5863_s15 + $0x20] sm:$0xff]  }
 0xdd6   : > { %4731 = vmatpush3.bf16.msra.mxu0 %v4841_v59 }
 0xdd7   : > { %v3675_v48 = vsel %vm692_vm1, %v3670_v47, 0.0  ;;  %4732 = vmatprep.subr.bf16.mxu0 %v4949_v1 }
 0xdd8   : > { %3676 = vadd.xlane.f32.xlu1 %v3675_v48 }
 0xdda   : > { %4733 = vmatpush3.bf16.msra.mxu0 %v4842_v55 }
 0xddb   : > { %4734 = vmatprep.subr.bf16.mxu0 %v4949_v1 }
 0xdde   : > { %4735 = vmatpush3.bf16.msra.mxu0 %v4843_v7 }
 0xddf   : > { %4736 = vmatprep.subr.bf16.mxu0 %v4949_v1  ;;  %v4216_v1 = vld [vmem:[%s5864_s16 + $0x1] ss:$0 sm:$0xff] }
 0xde2   : > { %4737 = vmatpush3.bf16.msra.mxu0 %v4844_v5 }
 0xe65   : > { %v3677_v50 = vpop.xlane.xlu1 %3676 }
 0xe66   : > { %v3678_v51 = vmul.f32 0.03125, %v3677_v50 }
 0xe68   : > { %v3679_v52 = vsub.f32 %v3670_v47, %v3678_v51 }
 0xe6a   : > { %v3680_v43 = vmul.f32 %v3679_v52, %v3679_v52 }
 0xe6c   : > { %v3681_v53 = vsel %vm692_vm1, %v3680_v43, 0.0 }
 0xe6d   : > { %3682 = vadd.xlane.f32.xlu0 %v3681_v53 }
 0xefa   : > { %v3683_v56 = vpop.xlane.xlu0 %3682 }
 0xefb   : > { %v3684_v57 = vmul.f32 0.03125, %v3683_v56 }
 0xefd   : > { %v3685_v60 = vadd.f32 1e-05, %v3684_v57 }
 0xeff   : > { %4881 = vrsqrt.f32 %v3685_v60 }
 0xf09   : > { %v4882_v61 = vpop.eup %4881 }
 0xf0a   : > { %v3687_v63 = vmul.f32 %v4882_v61, %v3679_v52 }
 0xf0c   : > { %v3694_v0 = vmul.f32 %v4196_v62, %v3687_v63 }
 0xf0e   : > { %v3701_v2 = vadd.f32 %v4197_v49, %v3694_v0 }
 0xf10   : > { %v3702_v3 = vmul.f32 %v3701_v2, %v5436_v17 }
 0xf12   : > { %v3708_v4 = vpack.c.bf16 %v3702_v3, %v3702_v3 }
 0xf14   : > { %4727 = vmatmul.mubr.msk.bf16.vlgmr.msra.gmra.mrb[100].mxu1 %vm692_vm1, %v3708_v4 }
 0xfe7   : > { %v3766_v8 = vpop.f32.mrb[100].mxu1 }
 0xfe8   : > { %v3767_v9 = vadd.f32 %v4203_v6, %v3766_v8  ;;  %v4728_v10 = vpop.f32.mrb[101].mxu1 }
 0xfe9   : > { %v3769_v11 = vpop.f32.mrb[102].mxu1 }
 0xfea   : > { %v3772_v12 = vmax.f32 %v3767_v9, 0.0  ;;  %v4729_v13 = vpop.f32.mrb[103].mxu1 }
 0xfec   : > { %v3782_v14 = vpack.c.bf16 %v3772_v12, %v3772_v12 }
 0xfee   : > { %4739 = vmatmul.mubr.msk.bf16.vlgmr.msra.gmra.mrb[100].mxu0 %vm2188_vm4, %v3782_v14 }
0x10c1   : > { %v3852_v15 = vpop.f32.mrb[100].mxu0 }
0x10c2   : > { %v3853_v16 = vadd.f32 %v4216_v1, %v3852_v15  ;;  %v4740_v18 = vpop.f32.mrb[101].mxu0 }
0x10c3   : > { %v3855_v58 = vpop.f32.mrb[102].mxu0 }
0x10c4   : > { %v4741_v19 = vpop.f32.mrb[103].mxu0  ;;  %v3858_v21 = vadd.f32 %v3853_v16, %v3702_v3 }
0x10c6   : > { %v3863_v22 = vsel %vm692_vm1, %v3858_v21, 0.0 }
0x10c7   : > { %3864 = vadd.xlane.f32.xlu1 %v3863_v22 }
0x1154   : > { %v3865_v23 = vpop.xlane.xlu1 %3864 }
0x1155   : > { %v3866_v24 = vmul.f32 0.03125, %v3865_v23 }
0x1157   : > { %v3867_v25 = vsub.f32 %v3858_v21, %v3866_v24 }
0x1159   : > { %v3868_v26 = vmul.f32 %v3867_v25, %v3867_v25 }
0x115b   : > { %v3869_v27 = vsel %vm692_vm1, %v3868_v26, 0.0 }
0x115c   : > { %3870 = vadd.xlane.f32.xlu1 %v3869_v27 }
0x11e9   : > { %v3871_v28 = vpop.xlane.xlu1 %3870 }
0x11ea   : > { %v3872_v29 = vmul.f32 0.03125, %v3871_v28 }
0x11ec   : > { %v3873_v30 = vadd.f32 1e-05, %v3872_v29 }
0x11ee   : > { %4883 = vrsqrt.f32 %v3873_v30 }
0x11f8   : > { %v4884_v31 = vpop.eup %4883 }
0x11f9   : > { %v3875_v33 = vmul.f32 %v4884_v31, %v3867_v25 }
0x11fb   : > { %v3882_v35 = vmul.f32 %v4224_v32, %v3875_v33 }
0x11fd   : > { %v3889_v36 = vadd.f32 %v4225_v34, %v3882_v35 }
0x11ff   : > { %v3890_v38 = vmul.f32 %v3889_v36, %v5436_v17 }
0x1201   : > { %3891 = vst.msk [vmem:[%s617_s25] sm:$0xff] %vm692_vm1, %v3890_v38 }
0x1202   : > { %4898 = shalt.err (!%p4895_p3)
}
0x1203   : > { %s4899_s4 = scalar_lea.hbm %s5805_s5, 128  ;;  %s4903_s22 = scalar_lea.hbm %s5867_s19, 256 }
0x1204   : > { %p4900_p4 = scmp.ne.s32.totalorder %s5805_s5, %s4899_s4  ;;  %p4904_p9 = scmp.lt.u32.totalorder %s5805_s5, %s5867_s19 }
0x1205   : > { %p4905_p10 = scmp.lt.u32.totalorder %s4903_s22, %s4899_s4  ;;  %p4907_p12 = scmp.lt.u32.totalorder %s4899_s4, %s5805_s5 }
0x1206   : > { %p4901_p7 = pnand %p4900_p4, %p5091_p5 }
0x1207   : > { %p4906_p11 = por %p4905_p10, %p4904_p9 }
0x1208   : > { %p4902_p8 = pneg %p4901_p7 }
0x1209   : > { %p4908_p13 = por %p4907_p12, %p4906_p11 }
0x120b   : > { %p4909_p0 = pnand %p4908_p13, %p4902_p8 }
0x120d   : > { %4912 = shalt.err (!%p4909_p0)
}
0x120e   : > { %4742 = dma.vmem_to_hbm [thread:$0]  (%p5091_p5), %s5807_s20, 128, %s5805_s5, %s3893_s26  }
0x120f PF: > { %s5893_s24 = sld [smem:[#allocation5_spill]]  ;;  %p4748_p1 = scmp.ge.s32.totalorder %s4947_s21, 2 }
0x1211   : > { %p4745_p2 = pnand %p4748_p1, %p5095_p6 }
0x1215   : > { %s3918_s2 = sand.u32 1, %s5893_s24  }
0x1216   : > { %s3919_s27 = scalar_lea.sflag [#allocation3], %s3918_s2 }
0x1217   : > { %4930 = dma.done.wait (!%p4745_p2), %s3919_s27, 128  }
0x1218   : > { %4932 = vsyncadd (!%p4745_p2), %s3919_s27, 4294967168  ;;  %s5895_s21 = sld [smem:[#allocation7_spill]]  ;;  %s5896_s4 = sld [smem:[#allocation6_spill]] }
0x1219   : > { %s5897_s20 = sld [smem:[#allocation8_spill]]  ;;  %s5898_s0 = smov %s4939_s30 }
0x121e   : > { %p29_p3 = scmp.ge.s32.totalorder %s5895_s21, 4   ;;  %s5899_s30 = smov %s5896_s4 }
0x1220   :  { %31 = sbr.rel (!%p29_p3) target bundleno = 10 (0xa), region = 153 }
0x1227   :  { %3924 = vsyncpa [#allocation3], 1 }
0x1228   :  { %3926 = vsyncpa [#allocation3 + $0x1], 1 }

</bundles_post_ra>
